<compile_context>
chip_gen: v7x
topology: tpu7x:2x2x1
jax: 0.10.0
libtpu: 0.0.40
codegen_flags: <defaults>
</compile_context>

<pallas_src>
import functools
import math

import jax
import jax.numpy as jnp
from jax.experimental import pallas as pl
from jax.experimental.pallas import tpu as pltpu

EPS = 1e-6
NEG_INF = -1e9
COMPUTE_DTYPE = jnp.float32  # bf16 recommended on v6e/v7x (loosen tolerance accordingly)

ENC_PARAM_ORDER = ["wqkv", "bqkv", "wo", "bo", "ln1_a", "ln1_b",
                   "w1", "b1", "w2", "b2", "ln2_a", "ln2_b"]

DEC_PARAM_ORDER = ["sa_wqkv", "sa_bqkv", "sa_wo", "sa_bo", "ln1_a", "ln1_b",
                   "ca_wq", "ca_bq", "ca_wkv", "ca_bkv", "ca_wo", "ca_bo", "ln2_a", "ln2_b",
                   "w1", "b1", "w2", "b2", "ln3_a", "ln3_b"]


# ---------------------------------------------------------------------------
# Shared math helpers (kernel + reference)
# ---------------------------------------------------------------------------
def _recip_approx(t):
    return pl.reciprocal(t, approx=True)   # EUP slot, effectively free


def _recip_exact(t):
    return 1.0 / t


def _layer_norm(x, a, b, recip, eps=EPS):
    # Annotated-Transformer LayerNorm: a * (x - mean) / (std + eps) + b, unbiased std (ddof=1)
    d = x.shape[-1]
    mean = jnp.mean(x, axis=-1, keepdims=True)
    var = jnp.sum((x - mean) ** 2, axis=-1, keepdims=True) * (1.0 / (d - 1))
    std = jnp.sqrt(var)
    return a * (x - mean) * recip(std + eps) + b


def _matmul(a, w, compute_dtype):
    return jnp.dot(a.astype(compute_dtype), w.astype(compute_dtype),
                   preferred_element_type=jnp.float32)


def _mha(q, k, v, add_mask, num_heads, compute_dtype):
    """Batched-head attention: q (Sq, D), k/v (Sk, D), add_mask broadcastable to (Sq, Sk)."""
    Sq, D = q.shape
    Sk = k.shape[0]
    dk = D // num_heads
    scale = 1.0 / math.sqrt(dk)
    # heads on a leading axis, dk stays the last/lane dim
    qh = jnp.transpose(q.reshape(Sq, num_heads, dk), (1, 0, 2)).astype(compute_dtype)
    kh = jnp.transpose(k.reshape(Sk, num_heads, dk), (1, 0, 2)).astype(compute_dtype)
    vh = jnp.transpose(v.reshape(Sk, num_heads, dk), (1, 0, 2)).astype(compute_dtype)
    s = jnp.einsum("hqd,hkd->hqk", qh, kh, preferred_element_type=jnp.float32) * scale
    s = s + add_mask[None, :, :]                      # additive mask, hoisted outside head math
    s = s - jnp.max(s, axis=-1, keepdims=True)
    p = jnp.exp(s)
    p = p * _recip_approx(jnp.sum(p, axis=-1, keepdims=True))
    o = jnp.einsum("hqk,hkd->hqd", p.astype(compute_dtype), vh,
                   preferred_element_type=jnp.float32)
    return jnp.transpose(o, (1, 0, 2)).reshape(Sq, D)


# ---------------------------------------------------------------------------
# Pallas kernels: whole layer stack per pallas_call, grid = (batch, layer)
# ---------------------------------------------------------------------------
def encoder_stack_kernel(x_ref, mask_ref,
                         wqkv_ref, bqkv_ref, wo_ref, bo_ref,
                         ln1_a_ref, ln1_b_ref,
                         w1_ref, b1_ref, w2_ref, b2_ref,
                         ln2_a_ref, ln2_b_ref,
                         norm_a_ref, norm_b_ref,
                         o_ref, *, num_heads, compute_dtype):
    l = pl.program_id(1)
    n_layers = pl.num_programs(1)

    @pl.when(l == 0)
    def _():
        o_ref[0] = x_ref[0]        # seed the resident activation block

    x = o_ref[0].astype(jnp.float32)                       # (S, D), resident across the layer axis
    D = x.shape[-1]
    add_mask = jnp.where(mask_ref[0] == 0.0, NEG_INF, 0.0)  # (1, S), computed once

    # --- sublayer 1: x + MHA(LayerNorm(x)) --- (fused QKV projection)
    xn = _layer_norm(x, ln1_a_ref[0], ln1_b_ref[0], _recip_approx)
    qkv = _matmul(xn, wqkv_ref[0], compute_dtype) + bqkv_ref[0]
    attn = _mha(qkv[:, :D], qkv[:, D:2 * D], qkv[:, 2 * D:], add_mask, num_heads, compute_dtype)
    x = x + _matmul(attn, wo_ref[0], compute_dtype) + bo_ref[0]

    # --- sublayer 2: x + FFN(LayerNorm(x)) ---
    xn = _layer_norm(x, ln2_a_ref[0], ln2_b_ref[0], _recip_approx)
    h = jnp.maximum(_matmul(xn, w1_ref[0], compute_dtype) + b1_ref[0], 0.0)
    x = x + _matmul(h, w2_ref[0], compute_dtype) + b2_ref[0]

    o_ref[0] = x.astype(o_ref.dtype)

    @pl.when(l == n_layers - 1)
    def _():
        o_ref[0] = _layer_norm(x, norm_a_ref[...], norm_b_ref[...],
                               _recip_approx).astype(o_ref.dtype)


def decoder_stack_kernel(tgt_ref, mem_ref, smask_ref, tmask_ref,
                         sa_wqkv_ref, sa_bqkv_ref, sa_wo_ref, sa_bo_ref,
                         ln1_a_ref, ln1_b_ref,
                         ca_wq_ref, ca_bq_ref, ca_wkv_ref, ca_bkv_ref,
                         ca_wo_ref, ca_bo_ref,
                         ln2_a_ref, ln2_b_ref,
                         w1_ref, b1_ref, w2_ref, b2_ref,
                         ln3_a_ref, ln3_b_ref,
                         norm_a_ref, norm_b_ref,
                         o_ref, *, num_heads, compute_dtype):
    l = pl.program_id(1)
    n_layers = pl.num_programs(1)

    @pl.when(l == 0)
    def _():
        o_ref[0] = tgt_ref[0]

    x = o_ref[0].astype(jnp.float32)          # (T, D), resident decoder activations
    mem = mem_ref[0].astype(jnp.float32)      # (S, D), encoder output
    D = x.shape[-1]

    self_mask = jnp.where(tmask_ref[0] == 0.0, NEG_INF, 0.0)    # (T, T)
    cross_mask = jnp.where(smask_ref[0] == 0.0, NEG_INF, 0.0)   # (1, S)

    # --- sublayer 1: masked self-attention (fused QKV) ---
    xn = _layer_norm(x, ln1_a_ref[0], ln1_b_ref[0], _recip_approx)
    qkv = _matmul(xn, sa_wqkv_ref[0], compute_dtype) + sa_bqkv_ref[0]
    attn = _mha(qkv[:, :D], qkv[:, D:2 * D], qkv[:, 2 * D:], self_mask, num_heads, compute_dtype)
    x = x + _matmul(attn, sa_wo_ref[0], compute_dtype) + sa_bo_ref[0]

    # --- sublayer 2: cross-attention over encoder memory (fused KV) ---
    xn = _layer_norm(x, ln2_a_ref[0], ln2_b_ref[0], _recip_approx)
    q = _matmul(xn, ca_wq_ref[0], compute_dtype) + ca_bq_ref[0]
    kv = _matmul(mem, ca_wkv_ref[0], compute_dtype) + ca_bkv_ref[0]
    attn = _mha(q, kv[:, :D], kv[:, D:], cross_mask, num_heads, compute_dtype)
    x = x + _matmul(attn, ca_wo_ref[0], compute_dtype) + ca_bo_ref[0]

    # --- sublayer 3: position-wise FFN ---
    xn = _layer_norm(x, ln3_a_ref[0], ln3_b_ref[0], _recip_approx)
    h = jnp.maximum(_matmul(xn, w1_ref[0], compute_dtype) + b1_ref[0], 0.0)
    x = x + _matmul(h, w2_ref[0], compute_dtype) + b2_ref[0]

    o_ref[0] = x.astype(o_ref.dtype)

    @pl.when(l == n_layers - 1)
    def _():
        o_ref[0] = _layer_norm(x, norm_a_ref[...], norm_b_ref[...],
                               _recip_approx).astype(o_ref.dtype)


# ---------------------------------------------------------------------------
# Wrappers (pallas_call plumbing)
# ---------------------------------------------------------------------------
def _batch_spec(arr):      # (B, ...) -> block (1, ...), indexed by the batch grid axis
    nd = arr.ndim
    return pl.BlockSpec((1,) + arr.shape[1:], lambda b, l, _nd=nd: (b,) + (0,) * (_nd - 1))


def _per_layer_spec(arr):  # (L, ...) -> block (1, ...), indexed by the layer grid axis
    nd = arr.ndim
    return pl.BlockSpec((1,) + arr.shape[1:], lambda b, l, _nd=nd: (l,) + (0,) * (_nd - 1))


def _shared_spec(arr):     # whole array, same block for every grid step
    nd = arr.ndim
    return pl.BlockSpec(arr.shape, lambda b, l, _nd=nd: (0,) * _nd)


def run_encoder(src, src_mask, p, num_heads, compute_dtype=COMPUTE_DTYPE):
    B, S, D = src.shape
    L = p["wqkv"].shape[0]
    in_specs = ([_batch_spec(src), _batch_spec(src_mask)]
                + [_per_layer_spec(p[n]) for n in ENC_PARAM_ORDER]
                + [_shared_spec(p["norm_a"]), _shared_spec(p["norm_b"])])
    kernel = functools.partial(encoder_stack_kernel, num_heads=num_heads,
                               compute_dtype=compute_dtype)
    return pl.pallas_call(
        kernel,
        out_shape=jax.ShapeDtypeStruct((B, S, D), src.dtype),
        grid=(B, L),
        in_specs=in_specs,
        out_specs=pl.BlockSpec((1, S, D), lambda b, l: (b, 0, 0)),
        compiler_params=pltpu.CompilerParams(
            dimension_semantics=("parallel", "arbitrary")),
    )(src, src_mask, *[p[n] for n in ENC_PARAM_ORDER], p["norm_a"], p["norm_b"])


def run_decoder(memory, tgt, src_mask, tgt_mask, p, num_heads, compute_dtype=COMPUTE_DTYPE):
    B, T, D = tgt.shape
    L = p["sa_wqkv"].shape[0]
    in_specs = ([_batch_spec(tgt), _batch_spec(memory),
                 _batch_spec(src_mask), _batch_spec(tgt_mask)]
                + [_per_layer_spec(p[n]) for n in DEC_PARAM_ORDER]
                + [_shared_spec(p["norm_a"]), _shared_spec(p["norm_b"])])
    kernel = functools.partial(decoder_stack_kernel, num_heads=num_heads,
                               compute_dtype=compute_dtype)
    return pl.pallas_call(
        kernel,
        out_shape=jax.ShapeDtypeStruct((B, T, D), tgt.dtype),
        grid=(B, L),
        in_specs=in_specs,
        out_specs=pl.BlockSpec((1, T, D), lambda b, l: (b, 0, 0)),
        compiler_params=pltpu.CompilerParams(
            dimension_semantics=("parallel", "arbitrary")),
    )(tgt, memory, src_mask, tgt_mask, *[p[n] for n in DEC_PARAM_ORDER],
      p["norm_a"], p["norm_b"])


def encoder_decoder_forward(src, tgt, src_mask, tgt_mask, enc_p, dec_p, num_heads,
                            compute_dtype=COMPUTE_DTYPE):
    # src_embed / tgt_embed are None in the reference module -> identity.
    memory = run_encoder(src, src_mask, enc_p, num_heads, compute_dtype)
    return run_decoder(memory, tgt, src_mask, tgt_mask, dec_p, num_heads, compute_dtype)


# ---------------------------------------------------------------------------
# Pure-JAX reference (same math, exact division) for a correctness check
# ---------------------------------------------------------------------------
def _ref_attention(q, k, v, add_mask, num_heads):
    B, Sq, D = q.shape
    Sk = k.shape[1]
    dk = D // num_heads
    qh = q.reshape(B, Sq, num_heads, dk)
    kh = k.reshape(B, Sk, num_heads, dk)
    vh = v.reshape(B, Sk, num_heads, dk)
    s = jnp.einsum("bqhd,bkhd->bhqk", qh, kh) / math.sqrt(dk)
    s = s + add_mask[:, None, :, :]
    a = jax.nn.softmax(s, axis=-1)
    return jnp.einsum("bhqk,bkhd->bqhd", a, vh).reshape(B, Sq, D)


def ref_encoder(src, src_mask, p, num_heads):
    x = src
    D = x.shape[-1]
    add_mask = jnp.where(src_mask == 0.0, NEG_INF, 0.0)     # (B, 1, S)
    for l in range(p["wqkv"].shape[0]):
        xn = _layer_norm(x, p["ln1_a"][l], p["ln1_b"][l], _recip_exact)
        qkv = xn @ p["wqkv"][l] + p["bqkv"][l]
        attn = _ref_attention(qkv[..., :D], qkv[..., D:2 * D], qkv[..., 2 * D:],
                              add_mask, num_heads)
        x = x + attn @ p["wo"][l] + p["bo"][l]
        xn = _layer_norm(x, p["ln2_a"][l], p["ln2_b"][l], _recip_exact)
        h = jnp.maximum(xn @ p["w1"][l] + p["b1"][l], 0.0)
        x = x + h @ p["w2"][l] + p["b2"][l]
    return _layer_norm(x, p["norm_a"], p["norm_b"], _recip_exact)


def ref_decoder(memory, tgt, src_mask, tgt_mask, p, num_heads):
    x = tgt
    D = x.shape[-1]
    self_mask = jnp.where(tgt_mask == 0.0, NEG_INF, 0.0)    # (B, T, T)
    cross_mask = jnp.where(src_mask == 0.0, NEG_INF, 0.0)   # (B, 1, S)
    for l in range(p["sa_wqkv"].shape[0]):
        xn = _layer_norm(x, p["ln1_a"][l], p["ln1_b"][l], _recip_exact)
        qkv = xn @ p["sa_wqkv"][l] + p["sa_bqkv"][l]
        attn = _ref_attention(qkv[..., :D], qkv[..., D:2 * D], qkv[..., 2 * D:],
                              self_mask, num_heads)
        x = x + attn @ p["sa_wo"][l] + p["sa_bo"][l]
        xn = _layer_norm(x, p["ln2_a"][l], p["ln2_b"][l], _recip_exact)
        q = xn @ p["ca_wq"][l] + p["ca_bq"][l]
        kv = memory @ p["ca_wkv"][l] + p["ca_bkv"][l]
        attn = _ref_attention(q, kv[..., :D], kv[..., D:], cross_mask, num_heads)
        x = x + attn @ p["ca_wo"][l] + p["ca_bo"][l]
        xn = _layer_norm(x, p["ln3_a"][l], p["ln3_b"][l], _recip_exact)
        h = jnp.maximum(xn @ p["w1"][l] + p["b1"][l], 0.0)
        x = x + h @ p["w2"][l] + p["b2"][l]
    return _layer_norm(x, p["norm_a"], p["norm_b"], _recip_exact)


def ref_forward(src, tgt, src_mask, tgt_mask, enc_p, dec_p, num_heads):
    memory = ref_encoder(src, src_mask, enc_p, num_heads)
    return ref_decoder(memory, tgt, src_mask, tgt_mask, dec_p, num_heads)


# ---------------------------------------------------------------------------
# Deterministic parameter init (layer-stacked, QKV / KV pre-fused)
# ---------------------------------------------------------------------------
def _nrm(k, shape, s=0.05):
    return s * jax.random.normal(k, shape, jnp.float32)


def init_encoder_params(key, n_layers, d_model, d_ff):
    ks = jax.random.split(key, 12)
    p = dict(
        wqkv=_nrm(ks[0], (n_layers, d_model, 3 * d_model)),
        bqkv=_nrm(ks[1], (n_layers, 1, 3 * d_model), 0.01),
        wo=_nrm(ks[2], (n_layers, d_model, d_model)),
        bo=_nrm(ks[3], (n_layers, 1, d_model), 0.01),
        ln1_a=1.0 + _nrm(ks[4], (n_layers, 1, d_model), 0.1),
        ln1_b=_nrm(ks[5], (n_layers, 1, d_model), 0.1),
        w1=_nrm(ks[6], (n_layers, d_model, d_ff)),
        b1=_nrm(ks[7], (n_layers, 1, d_ff), 0.01),
        w2=_nrm(ks[8], (n_layers, d_ff, d_model)),
        b2=_nrm(ks[9], (n_layers, 1, d_model), 0.01),
        ln2_a=1.0 + _nrm(ks[10], (n_layers, 1, d_model), 0.1),
        ln2_b=_nrm(ks[11], (n_layers, 1, d_model), 0.1),
    )
    ka, kb = jax.random.split(jax.random.fold_in(key, 17))
    p["norm_a"] = 1.0 + 0.1 * jax.random.normal(ka, (1, d_model), jnp.float32)
    p["norm_b"] = 0.1 * jax.random.normal(kb, (1, d_model), jnp.float32)
    return p


def init_decoder_params(key, n_layers, d_model, d_ff):
    ks = jax.random.split(key, 20)
    p = dict(
        sa_wqkv=_nrm(ks[0], (n_layers, d_model, 3 * d_model)),
        sa_bqkv=_nrm(ks[1], (n_layers, 1, 3 * d_model), 0.01),
        sa_wo=_nrm(ks[2], (n_layers, d_model, d_model)),
        sa_bo=_nrm(ks[3], (n_layers, 1, d_model), 0.01),
        ln1_a=1.0 + _nrm(ks[4], (n_layers, 1, d_model), 0.1),
        ln1_b=_nrm(ks[5], (n_layers, 1, d_model), 0.1),
        ca_wq=_nrm(ks[6], (n_layers, d_model, d_model)),
        ca_bq=_nrm(ks[7], (n_layers, 1, d_model), 0.01),
        ca_wkv=_nrm(ks[8], (n_layers, d_model, 2 * d_model)),
        ca_bkv=_nrm(ks[9], (n_layers, 1, 2 * d_model), 0.01),
        ca_wo=_nrm(ks[10], (n_layers, d_model, d_model)),
        ca_bo=_nrm(ks[11], (n_layers, 1, d_model), 0.01),
        ln2_a=1.0 + _nrm(ks[12], (n_layers, 1, d_model), 0.1),
        ln2_b=_nrm(ks[13], (n_layers, 1, d_model), 0.1),
        w1=_nrm(ks[14], (n_layers, d_model, d_ff)),
        b1=_nrm(ks[15], (n_layers, 1, d_ff), 0.01),
        w2=_nrm(ks[16], (n_layers, d_ff, d_model)),
        b2=_nrm(ks[17], (n_layers, 1, d_model), 0.01),
        ln3_a=1.0 + _nrm(ks[18], (n_layers, 1, d_model), 0.1),
        ln3_b=_nrm(ks[19], (n_layers, 1, d_model), 0.1),
    )
    ka, kb = jax.random.split(jax.random.fold_in(key, 23))
    p["norm_a"] = 1.0 + 0.1 * jax.random.normal(ka, (1, d_model), jnp.float32)
    p["norm_b"] = 0.1 * jax.random.normal(kb, (1, d_model), jnp.float32)
    return p


if __name__ == "__main__":
    # Small shapes; D = 128 so output stores are lane-dense (multiple of 128).
    B, S_SRC, S_TGT, D, H, D_FF = 2, 8, 8, 128, 4, 256
    N_ENC_LAYERS, N_DEC_LAYERS = 2, 2

    root = jax.random.PRNGKey(0)
    k_src, k_tgt, k_enc, k_dec = jax.random.split(root, 4)

    src = jax.random.normal(k_src, (B, S_SRC, D), jnp.float32)
    tgt = jax.random.normal(k_tgt, (B, S_TGT, D), jnp.float32)

    # src_mask (B, 1, S_src): batch 1 has its last 2 key positions padded out.
    src_mask = jnp.ones((B, 1, S_SRC), jnp.float32).at[1, 0, -2:].set(0.0)
    # tgt_mask (B, S_tgt, S_tgt): causal mask.
    tgt_mask = jnp.broadcast_to(jnp.tril(jnp.ones((S_TGT, S_TGT), jnp.float32)),
                                (B, S_TGT, S_TGT))

    enc_params = init_encoder_params(k_enc, N_ENC_LAYERS, D, D_FF)
    dec_params = init_decoder_params(k_dec, N_DEC_LAYERS, D, D_FF)

    out = encoder_decoder_forward(src, tgt, src_mask, tgt_mask, enc_params, dec_params, H)
    out = jax.block_until_ready(out)

    ref = ref_forward(src, tgt, src_mask, tgt_mask, enc_params, dec_params, H)
    assert out.shape == (B, S_TGT, D)
    # Tolerance loosened vs. the previous f32-exact version because the kernel uses
    # pl.reciprocal(approx=True) for the softmax denominator and LayerNorm 1/(std+eps).
    max_err = float(jnp.max(jnp.abs(out - ref)))
    assert jnp.allclose(out, ref, rtol=2e-2, atol=2e-2), max_err

    print("KERNEL_OK")
</pallas_src>

<mosaic_0001>
module attributes {stable_mosaic.version = 11 : i64} {
  func.func @encoder_stack_kernel(%arg0: i32, %arg1: i32, %arg2: memref<1x8x128xf32, #tpu.memory_space<vmem>>, %arg3: memref<1x1x8xf32, #tpu.memory_space<vmem>>, %arg4: memref<1x128x384xf32, #tpu.memory_space<vmem>>, %arg5: memref<1x1x384xf32, #tpu.memory_space<vmem>>, %arg6: memref<1x128x128xf32, #tpu.memory_space<vmem>>, %arg7: memref<1x1x128xf32, #tpu.memory_space<vmem>>, %arg8: memref<1x1x128xf32, #tpu.memory_space<vmem>>, %arg9: memref<1x1x128xf32, #tpu.memory_space<vmem>>, %arg10: memref<1x128x256xf32, #tpu.memory_space<vmem>>, %arg11: memref<1x1x256xf32, #tpu.memory_space<vmem>>, %arg12: memref<1x256x128xf32, #tpu.memory_space<vmem>>, %arg13: memref<1x1x128xf32, #tpu.memory_space<vmem>>, %arg14: memref<1x1x128xf32, #tpu.memory_space<vmem>>, %arg15: memref<1x1x128xf32, #tpu.memory_space<vmem>>, %arg16: memref<1x128xf32, #tpu.memory_space<vmem>>, %arg17: memref<1x128xf32, #tpu.memory_space<vmem>>, %arg18: memref<1x8x128xf32, #tpu.memory_space<vmem>>) attributes {dimension_semantics = [#tpu.dimension_semantics<parallel>, #tpu.dimension_semantics<arbitrary>], iteration_bounds = array<i64: 2, 2>, scalar_prefetch = 0 : i64, scratch_operands = 0 : i64, tpu.core_type = #tpu.core_type<tc>, window_params = [{transform_indices = @transform_0, window_bounds = array<i64: 1, 8, 128>}, {transform_indices = @transform_1, window_bounds = array<i64: 1, 1, 8>}, {transform_indices = @transform_2, window_bounds = array<i64: 1, 128, 384>}, {transform_indices = @transform_3, window_bounds = array<i64: 1, 1, 384>}, {transform_indices = @transform_4, window_bounds = array<i64: 1, 128, 128>}, {transform_indices = @transform_5, window_bounds = array<i64: 1, 1, 128>}, {transform_indices = @transform_6, window_bounds = array<i64: 1, 1, 128>}, {transform_indices = @transform_7, window_bounds = array<i64: 1, 1, 128>}, {transform_indices = @transform_8, window_bounds = array<i64: 1, 128, 256>}, {transform_indices = @transform_9, window_bounds = array<i64: 1, 1, 256>}, {transform_indices = @transform_10, window_bounds = array<i64: 1, 256, 128>}, {transform_indices = @transform_11, window_bounds = array<i64: 1, 1, 128>}, {transform_indices = @transform_12, window_bounds = array<i64: 1, 1, 128>}, {transform_indices = @transform_13, window_bounds = array<i64: 1, 1, 128>}, {pipeline_mode = #tpu.pipeline_mode<synchronous>, transform_indices = @transform_14, window_bounds = array<i64: 1, 128>}, {pipeline_mode = #tpu.pipeline_mode<synchronous>, transform_indices = @transform_15, window_bounds = array<i64: 1, 128>}, {transform_indices = @transform_16, window_bounds = array<i64: 1, 8, 128>}]} {
    %c0_i32 = arith.constant 0 : i32
    %0 = arith.cmpi eq, %arg1, %c0_i32 : i32
    %1 = arith.extui %0 : i1 to i32
    %c0_i32_0 = arith.constant 0 : i32
    %2 = arith.cmpi ne, %1, %c0_i32_0 : i32
    scf.if %2 {
      %c0_68 = arith.constant 0 : index
      %c0_69 = arith.constant 0 : index
      %c0_70 = arith.constant 0 : index
      %132 = vector.load %arg2[%c0_68, %c0_69, %c0_70] : memref<1x8x128xf32, #tpu.memory_space<vmem>>, vector<1x8x128xf32>
      %133 = vector.shape_cast %132 : vector<1x8x128xf32> to vector<8x128xf32>
      %c0_71 = arith.constant 0 : index
      %c0_72 = arith.constant 0 : index
      %c0_73 = arith.constant 0 : index
      %134 = vector.load %arg18[%c0_71, %c0_72, %c0_73] : memref<1x8x128xf32, #tpu.memory_space<vmem>>, vector<1x8x128xf32>
      %135 = vector.shape_cast %134 : vector<1x8x128xf32> to vector<8x128xf32>
      %136 = vector.shape_cast %133 : vector<8x128xf32> to vector<1x8x128xf32>
      tpu.vector_store %arg18[%c0_71, %c0_72, %c0_73], %136 {strides = array<i32>} : memref<1x8x128xf32, #tpu.memory_space<vmem>>, vector<1x8x128xf32>,
    } else {
    }
    %c0 = arith.constant 0 : index
    %c0_1 = arith.constant 0 : index
    %c0_2 = arith.constant 0 : index
    %3 = vector.load %arg18[%c0, %c0_1, %c0_2] : memref<1x8x128xf32, #tpu.memory_space<vmem>>, vector<1x8x128xf32>
    %4 = vector.shape_cast %3 : vector<1x8x128xf32> to vector<8x128xf32>
    %c0_3 = arith.constant 0 : index
    %c0_4 = arith.constant 0 : index
    %c0_5 = arith.constant 0 : index
    %5 = vector.load %arg3[%c0_3, %c0_4, %c0_5] : memref<1x1x8xf32, #tpu.memory_space<vmem>>, vector<1x1x8xf32>
    %6 = vector.shape_cast %5 : vector<1x1x8xf32> to vector<1x8xf32>
    %cst = arith.constant 0.000000e+00 : f32
    %7 = vector.broadcast %cst : f32 to vector<1x8xf32>
    %8 = arith.cmpf oeq, %6, %7 : vector<1x8xf32>
    %cst_6 = arith.constant -1.000000e+09 : f32
    %cst_7 = arith.constant 0.000000e+00 : f32
    %9 = vector.broadcast %cst_6 : f32 to vector<1x8xf32>
    %10 = vector.broadcast %cst_7 : f32 to vector<1x8xf32>
    %11 = arith.select %8, %9, %10 : vector<1x8xi1>, vector<1x8xf32>
    %c0_8 = arith.constant 0 : index
    %c0_9 = arith.constant 0 : index
    %c0_10 = arith.constant 0 : index
    %12 = vector.load %arg8[%c0_8, %c0_9, %c0_10] : memref<1x1x128xf32, #tpu.memory_space<vmem>>, vector<1x1x128xf32>
    %13 = vector.shape_cast %12 : vector<1x1x128xf32> to vector<1x128xf32>
    %c0_11 = arith.constant 0 : index
    %c0_12 = arith.constant 0 : index
    %c0_13 = arith.constant 0 : index
    %14 = vector.load %arg9[%c0_11, %c0_12, %c0_13] : memref<1x1x128xf32, #tpu.memory_space<vmem>>, vector<1x1x128xf32>
    %15 = vector.shape_cast %14 : vector<1x1x128xf32> to vector<1x128xf32>
    %cst_14 = arith.constant dense<0.000000e+00> : vector<8xf32>
    %16 = vector.multi_reduction <add>, %4, %cst_14 [1] : vector<8x128xf32> to vector<8xf32>
    %17 = vector.shape_cast %16 : vector<8xf32> to vector<8x1xf32>
    %cst_15 = arith.constant 1.280000e+02 : f32
    %18 = vector.broadcast %cst_15 : f32 to vector<8x1xf32>
    %19 = arith.divf %17, %18 : vector<8x1xf32>
    %20 = vector.broadcast %19 : vector<8x1xf32> to vector<8x128xf32>
    %21 = arith.subf %4, %20 : vector<8x128xf32>
    %22 = arith.mulf %21, %21 : vector<8x128xf32>
    %cst_16 = arith.constant dense<0.000000e+00> : vector<8xf32>
    %23 = vector.multi_reduction <add>, %22, %cst_16 [1] : vector<8x128xf32> to vector<8xf32>
    %24 = vector.shape_cast %23 : vector<8xf32> to vector<8x1xf32>
    %cst_17 = arith.constant 0.00787401571 : f32
    %25 = vector.broadcast %cst_17 : f32 to vector<8x1xf32>
    %26 = arith.mulf %24, %25 : vector<8x1xf32>
    %27 = math.sqrt %26 : vector<8x1xf32>
    %28 = vector.broadcast %19 : vector<8x1xf32> to vector<8x128xf32>
    %29 = arith.subf %4, %28 : vector<8x128xf32>
    %30 = vector.broadcast %13 : vector<1x128xf32> to vector<8x128xf32>
    %31 = arith.mulf %30, %29 : vector<8x128xf32>
    %cst_18 = arith.constant 9.99999997E-7 : f32
    %32 = vector.broadcast %cst_18 : f32 to vector<8x1xf32>
    %33 = arith.addf %27, %32 : vector<8x1xf32>
    %34 = tpu.reciprocal %33 {approx = true} : vector<8x1xf32> -> vector<8x1xf32>
    %35 = vector.broadcast %34 : vector<8x1xf32> to vector<8x128xf32>
    %36 = arith.mulf %31, %35 : vector<8x128xf32>
    %37 = vector.broadcast %15 : vector<1x128xf32> to vector<8x128xf32>
    %38 = arith.addf %36, %37 : vector<8x128xf32>
    %c0_19 = arith.constant 0 : index
    %c0_20 = arith.constant 0 : index
    %c0_21 = arith.constant 0 : index
    %39 = vector.load %arg4[%c0_19, %c0_20, %c0_21] : memref<1x128x384xf32, #tpu.memory_space<vmem>>, vector<1x128x384xf32>
    %40 = vector.shape_cast %39 : vector<1x128x384xf32> to vector<128x384xf32>
    %cst_22 = arith.constant dense<0.000000e+00> : vector<8x384xf32>
    %41 = tpu.matmul %38, %40, %cst_22 {dimension_numbers = #tpu.dot_dimension_numbers<[1], [0], [0], [1], [0, 0, 1, 1], [], []>} : vector<8x128xf32>, vector<128x384xf32>, vector<8x384xf32> -> vector<8x384xf32>
    %c0_23 = arith.constant 0 : index
    %c0_24 = arith.constant 0 : index
    %c0_25 = arith.constant 0 : index
    %42 = vector.load %arg5[%c0_23, %c0_24, %c0_25] : memref<1x1x384xf32, #tpu.memory_space<vmem>>, vector<1x1x384xf32>
    %43 = vector.shape_cast %42 : vector<1x1x384xf32> to vector<1x384xf32>
    %44 = vector.broadcast %43 : vector<1x384xf32> to vector<8x384xf32>
    %45 = arith.addf %41, %44 : vector<8x384xf32>
    %46 = vector.extract_strided_slice %45 {offsets = [0, 0], sizes = [8, 128], strides = [1, 1]} : vector<8x384xf32> to vector<8x128xf32>
    %47 = vector.extract_strided_slice %45 {offsets = [0, 128], sizes = [8, 128], strides = [1, 1]} : vector<8x384xf32> to vector<8x128xf32>
    %48 = vector.extract_strided_slice %45 {offsets = [0, 256], sizes = [8, 128], strides = [1, 1]} : vector<8x384xf32> to vector<8x128xf32>
    %49 = vector.shape_cast %46 : vector<8x128xf32> to vector<8x4x32xf32>
    %50 = tpu.transpose %49, [1, 0, 2] : vector<8x4x32xf32> -> vector<4x8x32xf32>
    %51 = vector.shape_cast %47 : vector<8x128xf32> to vector<8x4x32xf32>
    %52 = tpu.transpose %51, [1, 0, 2] : vector<8x4x32xf32> -> vector<4x8x32xf32>
    %53 = vector.shape_cast %48 : vector<8x128xf32> to vector<8x4x32xf32>
    %54 = tpu.transpose %53, [1, 0, 2] : vector<8x4x32xf32> -> vector<4x8x32xf32>
    "tpu.trace_start"() <{level = 10 : i32, message = "hqd,hkd->hqk"}> : () -> ()
    %cst_26 = arith.constant dense<0.000000e+00> : vector<4x8x8xf32>
    %55 = tpu.matmul %50, %52, %cst_26 {dimension_numbers = #tpu.dot_dimension_numbers<[2], [2], [1], [1], [0, 0, 0, 1, 1, 1], [0], [0]>} : vector<4x8x32xf32>, vector<4x8x32xf32>, vector<4x8x8xf32> -> vector<4x8x8xf32>
    "tpu.trace_stop"() : () -> ()
    %cst_27 = arith.constant 0.176776692 : f32
    %56 = vector.broadcast %cst_27 : f32 to vector<4x8x8xf32>
    %57 = arith.mulf %55, %56 : vector<4x8x8xf32>
    %58 = vector.shape_cast %11 : vector<1x8xf32> to vector<1x1x8xf32>
    %59 = vector.broadcast %58 : vector<1x1x8xf32> to vector<4x8x8xf32>
    %60 = arith.addf %57, %59 : vector<4x8x8xf32>
    %cst_28 = arith.constant dense<0xFF800000> : vector<4x8xf32>
    %61 = vector.multi_reduction <maximumf>, %60, %cst_28 [2] : vector<4x8x8xf32> to vector<4x8xf32>
    %62 = vector.shape_cast %61 : vector<4x8xf32> to vector<4x8x1xf32>
    %63 = vector.broadcast %62 : vector<4x8x1xf32> to vector<4x8x8xf32>
    %64 = arith.subf %60, %63 : vector<4x8x8xf32>
    %65 = math.exp %64 : vector<4x8x8xf32>
    %cst_29 = arith.constant dense<0.000000e+00> : vector<4x8xf32>
    %66 = vector.multi_reduction <add>, %65, %cst_29 [2] : vector<4x8x8xf32> to vector<4x8xf32>
    %67 = vector.shape_cast %66 : vector<4x8xf32> to vector<4x8x1xf32>
    %68 = tpu.reciprocal %67 {approx = true} : vector<4x8x1xf32> -> vector<4x8x1xf32>
    %69 = vector.broadcast %68 : vector<4x8x1xf32> to vector<4x8x8xf32>
    %70 = arith.mulf %65, %69 : vector<4x8x8xf32>
    "tpu.trace_start"() <{level = 10 : i32, message = "hqk,hkd->hqd"}> : () -> ()
    %cst_30 = arith.constant dense<0.000000e+00> : vector<4x8x32xf32>
    %71 = tpu.matmul %70, %54, %cst_30 {dimension_numbers = #tpu.dot_dimension_numbers<[2], [1], [1], [2], [0, 0, 0, 1, 1, 2], [0], [0]>} : vector<4x8x8xf32>, vector<4x8x32xf32>, vector<4x8x32xf32> -> vector<4x8x32xf32>
    "tpu.trace_stop"() : () -> ()
    %72 = tpu.transpose %71, [1, 0, 2] : vector<4x8x32xf32> -> vector<8x4x32xf32>
    %73 = vector.shape_cast %72 : vector<8x4x32xf32> to vector<8x128xf32>
    %c0_31 = arith.constant 0 : index
    %c0_32 = arith.constant 0 : index
    %c0_33 = arith.constant 0 : index
    %74 = vector.load %arg6[%c0_31, %c0_32, %c0_33] : memref<1x128x128xf32, #tpu.memory_space<vmem>>, vector<1x128x128xf32>
    %75 = vector.shape_cast %74 : vector<1x128x128xf32> to vector<128x128xf32>
    %cst_34 = arith.constant dense<0.000000e+00> : vector<8x128xf32>
    %76 = tpu.matmul %73, %75, %cst_34 {dimension_numbers = #tpu.dot_dimension_numbers<[1], [0], [0], [1], [0, 0, 1, 1], [], []>} : vector<8x128xf32>, vector<128x128xf32>, vector<8x128xf32> -> vector<8x128xf32>
    %77 = arith.addf %4, %76 : vector<8x128xf32>
    %c0_35 = arith.constant 0 : index
    %c0_36 = arith.constant 0 : index
    %c0_37 = arith.constant 0 : index
    %78 = vector.load %arg7[%c0_35, %c0_36, %c0_37] : memref<1x1x128xf32, #tpu.memory_space<vmem>>, vector<1x1x128xf32>
    %79 = vector.shape_cast %78 : vector<1x1x128xf32> to vector<1x128xf32>
    %80 = vector.broadcast %79 : vector<1x128xf32> to vector<8x128xf32>
    %81 = arith.addf %77, %80 : vector<8x128xf32>
    %c0_38 = arith.constant 0 : index
    %c0_39 = arith.constant 0 : index
    %c0_40 = arith.constant 0 : index
    %82 = vector.load %arg14[%c0_38, %c0_39, %c0_40] : memref<1x1x128xf32, #tpu.memory_space<vmem>>, vector<1x1x128xf32>
    %83 = vector.shape_cast %82 : vector<1x1x128xf32> to vector<1x128xf32>
    %c0_41 = arith.constant 0 : index
    %c0_42 = arith.constant 0 : index
    %c0_43 = arith.constant 0 : index
    %84 = vector.load %arg15[%c0_41, %c0_42, %c0_43] : memref<1x1x128xf32, #tpu.memory_space<vmem>>, vector<1x1x128xf32>
    %85 = vector.shape_cast %84 : vector<1x1x128xf32> to vector<1x128xf32>
    %cst_44 = arith.constant dense<0.000000e+00> : vector<8xf32>
    %86 = vector.multi_reduction <add>, %81, %cst_44 [1] : vector<8x128xf32> to vector<8xf32>
    %87 = vector.shape_cast %86 : vector<8xf32> to vector<8x1xf32>
    %cst_45 = arith.constant 1.280000e+02 : f32
    %88 = vector.broadcast %cst_45 : f32 to vector<8x1xf32>
    %89 = arith.divf %87, %88 : vector<8x1xf32>
    %90 = vector.broadcast %89 : vector<8x1xf32> to vector<8x128xf32>
    %91 = arith.subf %81, %90 : vector<8x128xf32>
    %92 = arith.mulf %91, %91 : vector<8x128xf32>
    %cst_46 = arith.constant dense<0.000000e+00> : vector<8xf32>
    %93 = vector.multi_reduction <add>, %92, %cst_46 [1] : vector<8x128xf32> to vector<8xf32>
    %94 = vector.shape_cast %93 : vector<8xf32> to vector<8x1xf32>
    %cst_47 = arith.constant 0.00787401571 : f32
    %95 = vector.broadcast %cst_47 : f32 to vector<8x1xf32>
    %96 = arith.mulf %94, %95 : vector<8x1xf32>
    %97 = math.sqrt %96 : vector<8x1xf32>
    %98 = vector.broadcast %89 : vector<8x1xf32> to vector<8x128xf32>
    %99 = arith.subf %81, %98 : vector<8x128xf32>
    %100 = vector.broadcast %83 : vector<1x128xf32> to vector<8x128xf32>
    %101 = arith.mulf %100, %99 : vector<8x128xf32>
    %cst_48 = arith.constant 9.99999997E-7 : f32
    %102 = vector.broadcast %cst_48 : f32 to vector<8x1xf32>
    %103 = arith.addf %97, %102 : vector<8x1xf32>
    %104 = tpu.reciprocal %103 {approx = true} : vector<8x1xf32> -> vector<8x1xf32>
    %105 = vector.broadcast %104 : vector<8x1xf32> to vector<8x128xf32>
    %106 = arith.mulf %101, %105 : vector<8x128xf32>
    %107 = vector.broadcast %85 : vector<1x128xf32> to vector<8x128xf32>
    %108 = arith.addf %106, %107 : vector<8x128xf32>
    %c0_49 = arith.constant 0 : index
    %c0_50 = arith.constant 0 : index
    %c0_51 = arith.constant 0 : index
    %109 = vector.load %arg10[%c0_49, %c0_50, %c0_51] : memref<1x128x256xf32, #tpu.memory_space<vmem>>, vector<1x128x256xf32>
    %110 = vector.shape_cast %109 : vector<1x128x256xf32> to vector<128x256xf32>
    %cst_52 = arith.constant dense<0.000000e+00> : vector<8x256xf32>
    %111 = tpu.matmul %108, %110, %cst_52 {dimension_numbers = #tpu.dot_dimension_numbers<[1], [0], [0], [1], [0, 0, 1, 1], [], []>} : vector<8x128xf32>, vector<128x256xf32>, vector<8x256xf32> -> vector<8x256xf32>
    %c0_53 = arith.constant 0 : index
    %c0_54 = arith.constant 0 : index
    %c0_55 = arith.constant 0 : index
    %112 = vector.load %arg11[%c0_53, %c0_54, %c0_55] : memref<1x1x256xf32, #tpu.memory_space<vmem>>, vector<1x1x256xf32>
    %113 = vector.shape_cast %112 : vector<1x1x256xf32> to vector<1x256xf32>
    %114 = vector.broadcast %113 : vector<1x256xf32> to vector<8x256xf32>
    %115 = arith.addf %111, %114 : vector<8x256xf32>
    %cst_56 = arith.constant 0.000000e+00 : f32
    %116 = vector.broadcast %cst_56 : f32 to vector<8x256xf32>
    %117 = arith.maximumf %115, %116 : vector<8x256xf32>
    %c0_57 = arith.constant 0 : index
    %c0_58 = arith.constant 0 : index
    %c0_59 = arith.constant 0 : index
    %118 = vector.load %arg12[%c0_57, %c0_58, %c0_59] : memref<1x256x128xf32, #tpu.memory_space<vmem>>, vector<1x256x128xf32>
    %119 = vector.shape_cast %118 : vector<1x256x128xf32> to vector<256x128xf32>
    %cst_60 = arith.constant dense<0.000000e+00> : vector<8x128xf32>
    %120 = tpu.matmul %117, %119, %cst_60 {dimension_numbers = #tpu.dot_dimension_numbers<[1], [0], [0], [1], [0, 0, 1, 1], [], []>} : vector<8x256xf32>, vector<256x128xf32>, vector<8x128xf32> -> vector<8x128xf32>
    %121 = arith.addf %81, %120 : vector<8x128xf32>
    %c0_61 = arith.constant 0 : index
    %c0_62 = arith.constant 0 : index
    %c0_63 = arith.constant 0 : index
    %122 = vector.load %arg13[%c0_61, %c0_62, %c0_63] : memref<1x1x128xf32, #tpu.memory_space<vmem>>, vector<1x1x128xf32>
    %123 = vector.shape_cast %122 : vector<1x1x128xf32> to vector<1x128xf32>
    %124 = vector.broadcast %123 : vector<1x128xf32> to vector<8x128xf32>
    %125 = arith.addf %121, %124 : vector<8x128xf32>
    %c0_64 = arith.constant 0 : index
    %c0_65 = arith.constant 0 : index
    %c0_66 = arith.constant 0 : index
    %126 = vector.load %arg18[%c0_64, %c0_65, %c0_66] : memref<1x8x128xf32, #tpu.memory_space<vmem>>, vector<1x8x128xf32>
    %127 = vector.shape_cast %126 : vector<1x8x128xf32> to vector<8x128xf32>
    %128 = vector.shape_cast %125 : vector<8x128xf32> to vector<1x8x128xf32>
    tpu.vector_store %arg18[%c0_64, %c0_65, %c0_66], %128 {strides = array<i32>} : memref<1x8x128xf32, #tpu.memory_space<vmem>>, vector<1x8x128xf32>,
    %c1_i32 = arith.constant 1 : i32
    %129 = arith.cmpi eq, %arg1, %c1_i32 : i32
    %130 = arith.extui %129 : i1 to i32
    %c0_i32_67 = arith.constant 0 : i32
    %131 = arith.cmpi ne, %130, %c0_i32_67 : i32
    scf.if %131 {
      %c0_68 = arith.constant 0 : index
      %c0_69 = arith.constant 0 : index
      %132 = vector.load %arg16[%c0_68, %c0_69] : memref<1x128xf32, #tpu.memory_space<vmem>>, vector<1x128xf32>
      %c0_70 = arith.constant 0 : index
      %c0_71 = arith.constant 0 : index
      %133 = vector.load %arg17[%c0_70, %c0_71] : memref<1x128xf32, #tpu.memory_space<vmem>>, vector<1x128xf32>
      %cst_72 = arith.constant dense<0.000000e+00> : vector<8xf32>
      %134 = vector.multi_reduction <add>, %125, %cst_72 [1] : vector<8x128xf32> to vector<8xf32>
      %135 = vector.shape_cast %134 : vector<8xf32> to vector<8x1xf32>
      %cst_73 = arith.constant 1.280000e+02 : f32
      %136 = vector.broadcast %cst_73 : f32 to vector<8x1xf32>
      %137 = arith.divf %135, %136 : vector<8x1xf32>
      %138 = vector.broadcast %137 : vector<8x1xf32> to vector<8x128xf32>
      %139 = arith.subf %125, %138 : vector<8x128xf32>
      %140 = arith.mulf %139, %139 : vector<8x128xf32>
      %cst_74 = arith.constant dense<0.000000e+00> : vector<8xf32>
      %141 = vector.multi_reduction <add>, %140, %cst_74 [1] : vector<8x128xf32> to vector<8xf32>
      %142 = vector.shape_cast %141 : vector<8xf32> to vector<8x1xf32>
      %cst_75 = arith.constant 0.00787401571 : f32
      %143 = vector.broadcast %cst_75 : f32 to vector<8x1xf32>
      %144 = arith.mulf %142, %143 : vector<8x1xf32>
      %145 = math.sqrt %144 : vector<8x1xf32>
      %146 = vector.broadcast %137 : vector<8x1xf32> to vector<8x128xf32>
      %147 = arith.subf %125, %146 : vector<8x128xf32>
      %148 = vector.broadcast %132 : vector<1x128xf32> to vector<8x128xf32>
      %149 = arith.mulf %148, %147 : vector<8x128xf32>
      %cst_76 = arith.constant 9.99999997E-7 : f32
      %150 = vector.broadcast %cst_76 : f32 to vector<8x1xf32>
      %151 = arith.addf %145, %150 : vector<8x1xf32>
      %152 = tpu.reciprocal %151 {approx = true} : vector<8x1xf32> -> vector<8x1xf32>
      %153 = vector.broadcast %152 : vector<8x1xf32> to vector<8x128xf32>
      %154 = arith.mulf %149, %153 : vector<8x128xf32>
      %155 = vector.broadcast %133 : vector<1x128xf32> to vector<8x128xf32>
      %156 = arith.addf %154, %155 : vector<8x128xf32>
      %c0_77 = arith.constant 0 : index
      %c0_78 = arith.constant 0 : index
      %c0_79 = arith.constant 0 : index
      %157 = vector.load %arg18[%c0_77, %c0_78, %c0_79] : memref<1x8x128xf32, #tpu.memory_space<vmem>>, vector<1x8x128xf32>
      %158 = vector.shape_cast %157 : vector<1x8x128xf32> to vector<8x128xf32>
      %159 = vector.shape_cast %156 : vector<8x128xf32> to vector<1x8x128xf32>
      tpu.vector_store %arg18[%c0_77, %c0_78, %c0_79], %159 {strides = array<i32>} : memref<1x8x128xf32, #tpu.memory_space<vmem>>, vector<1x8x128xf32>,
    } else {
    }
    return
  }
  func.func @transform_0(%arg0: i32, %arg1: i32) -> (i32, i32, i32) {
    %c0_i32 = arith.constant 0 : i32
    %c0_i32_0 = arith.constant 0 : i32
    %c0_i32_1 = arith.constant 0 : i32
    return %arg0, %c0_i32, %c0_i32_0 : i32, i32, i32
  }
  func.func @transform_1(%arg0: i32, %arg1: i32) -> (i32, i32, i32) {
    %c0_i32 = arith.constant 0 : i32
    %c0_i32_0 = arith.constant 0 : i32
    %c0_i32_1 = arith.constant 0 : i32
    return %arg0, %c0_i32, %c0_i32_0 : i32, i32, i32
  }
  func.func @transform_2(%arg0: i32, %arg1: i32) -> (i32, i32, i32) {
    %c0_i32 = arith.constant 0 : i32
    %c0_i32_0 = arith.constant 0 : i32
    %c0_i32_1 = arith.constant 0 : i32
    return %arg1, %c0_i32, %c0_i32_0 : i32, i32, i32
  }
  func.func @transform_3(%arg0: i32, %arg1: i32) -> (i32, i32, i32) {
    %c0_i32 = arith.constant 0 : i32
    %c0_i32_0 = arith.constant 0 : i32
    %c0_i32_1 = arith.constant 0 : i32
    return %arg1, %c0_i32, %c0_i32_0 : i32, i32, i32
  }
  func.func @transform_4(%arg0: i32, %arg1: i32) -> (i32, i32, i32) {
    %c0_i32 = arith.constant 0 : i32
    %c0_i32_0 = arith.constant 0 : i32
    %c0_i32_1 = arith.constant 0 : i32
    return %arg1, %c0_i32, %c0_i32_0 : i32, i32, i32
  }
  func.func @transform_5(%arg0: i32, %arg1: i32) -> (i32, i32, i32) {
    %c0_i32 = arith.constant 0 : i32
    %c0_i32_0 = arith.constant 0 : i32
    %c0_i32_1 = arith.constant 0 : i32
    return %arg1, %c0_i32, %c0_i32_0 : i32, i32, i32
  }
  func.func @transform_6(%arg0: i32, %arg1: i32) -> (i32, i32, i32) {
    %c0_i32 = arith.constant 0 : i32
    %c0_i32_0 = arith.constant 0 : i32
    %c0_i32_1 = arith.constant 0 : i32
    return %arg1, %c0_i32, %c0_i32_0 : i32, i32, i32
  }
  func.func @transform_7(%arg0: i32, %arg1: i32) -> (i32, i32, i32) {
    %c0_i32 = arith.constant 0 : i32
    %c0_i32_0 = arith.constant 0 : i32
    %c0_i32_1 = arith.constant 0 : i32
    return %arg1, %c0_i32, %c0_i32_0 : i32, i32, i32
  }
  func.func @transform_8(%arg0: i32, %arg1: i32) -> (i32, i32, i32) {
    %c0_i32 = arith.constant 0 : i32
    %c0_i32_0 = arith.constant 0 : i32
    %c0_i32_1 = arith.constant 0 : i32
    return %arg1, %c0_i32, %c0_i32_0 : i32, i32, i32
  }
  func.func @transform_9(%arg0: i32, %arg1: i32) -> (i32, i32, i32) {
    %c0_i32 = arith.constant 0 : i32
    %c0_i32_0 = arith.constant 0 : i32
    %c0_i32_1 = arith.constant 0 : i32
    return %arg1, %c0_i32, %c0_i32_0 : i32, i32, i32
  }
  func.func @transform_10(%arg0: i32, %arg1: i32) -> (i32, i32, i32) {
    %c0_i32 = arith.constant 0 : i32
    %c0_i32_0 = arith.constant 0 : i32
    %c0_i32_1 = arith.constant 0 : i32
    return %arg1, %c0_i32, %c0_i32_0 : i32, i32, i32
  }
  func.func @transform_11(%arg0: i32, %arg1: i32) -> (i32, i32, i32) {
    %c0_i32 = arith.constant 0 : i32
    %c0_i32_0 = arith.constant 0 : i32
    %c0_i32_1 = arith.constant 0 : i32
    return %arg1, %c0_i32, %c0_i32_0 : i32, i32, i32
  }
  func.func @transform_12(%arg0: i32, %arg1: i32) -> (i32, i32, i32) {
    %c0_i32 = arith.constant 0 : i32
    %c0_i32_0 = arith.constant 0 : i32
    %c0_i32_1 = arith.constant 0 : i32
    return %arg1, %c0_i32, %c0_i32_0 : i32, i32, i32
  }
  func.func @transform_13(%arg0: i32, %arg1: i32) -> (i32, i32, i32) {
    %c0_i32 = arith.constant 0 : i32
    %c0_i32_0 = arith.constant 0 : i32
    %c0_i32_1 = arith.constant 0 : i32
    return %arg1, %c0_i32, %c0_i32_0 : i32, i32, i32
  }
  func.func @transform_14(%arg0: i32, %arg1: i32) -> (i32, i32) {
    %c0_i32 = arith.constant 0 : i32
    %c0_i32_0 = arith.constant 0 : i32
    %c0_i32_1 = arith.constant 0 : i32
    return %c0_i32, %c0_i32_0 : i32, i32
  }
  func.func @transform_15(%arg0: i32, %arg1: i32) -> (i32, i32) {
    %c0_i32 = arith.constant 0 : i32
    %c0_i32_0 = arith.constant 0 : i32
    %c0_i32_1 = arith.constant 0 : i32
    return %c0_i32, %c0_i32_0 : i32, i32
  }
  func.func @transform_16(%arg0: i32, %arg1: i32) -> (i32, i32, i32) {
    %c0_i32 = arith.constant 0 : i32
    %c0_i32_0 = arith.constant 0 : i32
    %c0_i32_1 = arith.constant 0 : i32
    return %arg0, %c0_i32, %c0_i32_0 : i32, i32, i32
  }
}

</mosaic_0001>

<bundles_post_ra>
// kernel: tpu_custom_call.1
= control target key start
LH: loop header
LB: loop body
LE: loop exit
PB: predicated region body
PF: predicated region fallthrough
CT: control target
= control target key end

     0   :  { %s4942_s0 = inlined_call_operand.hbm [shape: f32[2,8,128], index: 0, kind: input, shape index: {}]   ;;  %s4943_s1 = inlined_call_operand.hbm [shape: f32[2,1,8], index: 1, kind: input, shape index: {}]   ;;  %s4944_s2 = inlined_call_operand.hbm [shape: f32[2,128,384], index: 2, kind: input, shape index: {}]   ;;  %s4945_s3 = inlined_call_operand.vmem [shape: f32[2,1,384], index: 3, kind: input, shape index: {}]   ;;  %s4946_s4 = inlined_call_operand.hbm [shape: f32[2,128,128], index: 4, kind: input, shape index: {}]   ;;  %s4947_s5 = inlined_call_operand.vmem [shape: f32[2,1,128], index: 5, kind: input, shape index: {}]   ;;  %s4948_s6 = inlined_call_operand.vmem [shape: f32[2,1,128], index: 6, kind: input, shape index: {}]   ;;  %s4949_s7 = inlined_call_operand.vmem [shape: f32[2,1,128], index: 7, kind: input, shape index: {}]   ;;  %s4950_s8 = inlined_call_operand.hbm [shape: f32[2,128,256], index: 8, kind: input, shape index: {}]   ;;  %s4951_s9 = inlined_call_operand.vmem [shape: f32[2,1,256], index: 9, kind: input, shape index: {}]   ;;  %s4952_s10 = inlined_call_operand.hbm [shape: f32[2,256,128], index: 10, kind: input, shape index: {}]   ;;  %s4953_s11 = inlined_call_operand.vmem [shape: f32[2,1,128], index: 11, kind: input, shape index: {}]   ;;  %s4954_s12 = inlined_call_operand.vmem [shape: f32[2,1,128], index: 12, kind: input, shape index: {}]   ;;  %s4955_s13 = inlined_call_operand.vmem [shape: f32[2,1,128], index: 13, kind: input, shape index: {}]   ;;  %s4956_s14 = inlined_call_operand.vmem [shape: f32[1,128], index: 14, kind: input, shape index: {}]   ;;  %s4957_s15 = inlined_call_operand.vmem [shape: f32[1,128], index: 15, kind: input, shape index: {}]   ;;  %s4958_s16 = inlined_call_operand.hbm [shape: f32[2,8,128], index: 16, kind: output, shape index: {}]  }
   0x1   :  { %4991 = sst [smem:[#allocation37_spill]] %s4942_s0 }
   0x2   :  { %4992 = sst [smem:[#allocation38_spill]] %s4943_s1 }
   0x3   :  { %4993 = sst [smem:[#allocation39_spill]] %s4944_s2 }
   0x4   :  { %4994 = sst [smem:[#allocation40_spill]] %s4945_s3 }
   0x5   :  { %4995 = sst [smem:[#allocation41_spill]] %s4946_s4 }
   0x6   :  { %4996 = sst [smem:[#allocation42_spill]] %s4947_s5 }
   0x7   :  { %4997 = sst [smem:[#allocation43_spill]] %s4948_s6 }
   0x8   :  { %4998 = sst [smem:[#allocation44_spill]] %s4949_s7 }
   0x9   :  { %4999 = sst [smem:[#allocation45_spill]] %s4950_s8 }
   0xa   :  { %5000 = sst [smem:[#allocation46_spill]] %s4951_s9 }
   0xb   :  { %5001 = sst [smem:[#allocation47_spill]] %s4952_s10 }
   0xc   :  { %5002 = sst [smem:[#allocation48_spill]] %s4953_s11 }
   0xd   :  { %5003 = sst [smem:[#allocation49_spill]] %s4954_s12 }
   0xe   :  { %5004 = sst [smem:[#allocation50_spill]] %s4955_s13 }
   0xf   :  { %5005 = sst [smem:[#allocation51_spill]] %s4956_s14 }
  0x10   :  { %5006 = sst [smem:[#allocation52_spill]] %s4957_s15 }
  0x11   :  { %5007 = sst [smem:[#allocation53_spill]] %s4958_s16 }
  0x12   :  { %21 = vsyncpa [#allocation3], 0 }
  0x13   :  { %23 = vsyncpa [#allocation3 + $0x1], 0 }
  0x14   :  { %24 = vsyncpa [#allocation6], 0 }
  0x15   :  { %26 = vsyncpa [#allocation6 + $0x1], 0 }
  0x16   :  { %27 = vsyncpa [#allocation9], 0 }
  0x17   :  { %29 = vsyncpa [#allocation9 + $0x1], 0 }
  0x18   :  { %30 = vsyncpa [#allocation12], 0 }
  0x19   :  { %32 = vsyncpa [#allocation12 + $0x1], 0 }
  0x1a   :  { %33 = vsyncpa [#allocation4], 0 }
  0x1b   :  { %35 = vsyncpa [#allocation4 + $0x1], 0  ;;  %s4028_s21 = smov 0   ;;  %s4030_s22 = smov 0  }
  0x1c   :  { %s4032_s23 = smov 0   ;;  %s4034_s24 = smov 0  }
  0x1d   :  { %s4036_s25 = smov 0   ;;  %s4038_s26 = smov 0  }
  0x1e   :  { %s4040_s27 = smov 0   ;;  %s4042_s28 = smov 0  }
  0x1f   :  { %s4044_s29 = smov 0   ;;  %s4046_s30 = smov 0  }
  0x20   :  { %s4048_s0 = smov 0  }
  0x21 LB: > { %5008 = sst [smem:[#allocation20_spill]] %s3884_s22  ;;  %s4084_s17 = sadd.s32 4294967295, %s3920_s0   ;;  %s3920_s0 = sphi %s4048_s0, %s41_s0   ;;  %s3916_s30 = sphi %s4046_s30, %s5093_s30   ;;  %s3912_s29 = sphi %s4044_s29, %s5092_s29   ;;  %s3908_s28 = sphi %s4042_s28, %s5091_s28   ;;  %s3904_s27 = sphi %s4040_s27, %s5090_s27   ;;  %s3900_s26 = sphi %s4038_s26, %s5089_s26   ;;  %s3896_s25 = sphi %s4036_s25, %s5095_s25   ;;  %s3892_s24 = sphi %s4034_s24, %s5094_s24   ;;  %s3888_s23 = sphi %s4032_s23, %s5087_s23   ;;  %s3884_s22 = sphi %s4030_s22, %s5086_s22   ;;  %s3880_s21 = sphi %s4028_s21, %s5085_s21  }
  0x22   : > { %5009 = sst [smem:[#allocation21_spill]] %s3888_s23  ;;  %s3030_s18 = sadd.s32 4294967294, %s3920_s0  }
  0x23   : > { %5010 = sst [smem:[#allocation22_spill]] %s3892_s24  ;;  %s50_s19 = sadd.s32 1, %s3912_s29 }
  0x24   : > { %5011 = sst [smem:[#allocation23_spill]] %s3900_s26  ;;  %s53_s20 = sadd.s32 1, %s3916_s30 }
  0x25   : > { %5012 = sst [smem:[#allocation24_spill]] %s3904_s27  ;;  %p51_p0 = scmp.ge.s32.totalorder %s50_s19, 2 }
  0x26   : > { %5013 = sst [smem:[#allocation25_spill]] %s3908_s28  ;;  %s60_s16 = sadd.s32 1, %s3900_s26 }
  0x27   : > { %5014 = sst [smem:[#allocation26_spill]] %s3912_s29  ;;  %p67_p1 = scmp.ne.s32.totalorder %s3900_s26, %s3896_s25 }
  0x28   : > { %5015 = sst [smem:[#allocation27_spill]] %s3916_s30  ;;  %p68_p2 = scmp.eq.s32.totalorder %s3920_s0, 0 }
  0x29   : > { %5016 = sst [smem:[#allocation28_spill]] %s3920_s0  ;;  %s5097_s19 = smov (%p51_p0, %s50_s19), 0 }
  0x2a   : > { %5017 = sst [smem:[#allocation29_spill]] %s4084_s17  ;;  %s5099_s20 = smov (!%p51_p0, %s53_s20), %s3916_s30 }
  0x2b   : > { %5018 = sst [smem:[#allocation30_spill]] %s5097_s19  ;;  %p4101_p3 = por %p68_p2, %p67_p1 }
  0x2c   : > { %p4962_p4 = scmp.ne.s32.totalorder %s3896_s25, %s3892_s24  ;;  %p55_p5 = scmp.ge.s32.totalorder %s5099_s20, 2 }
  0x2d   : > { %p74_p6 = scmp.eq.s32.totalorder %s4084_s17, 0  ;;  %s109_s15 = ssub.s32 %s3912_s29, %s5097_s19 }
  0x2e   : > { %s112_s14 = sadd.s32 1, %s3888_s23  ;;  %s5101_s20 = smov (%p55_p5, %s5099_s20), 0 }
  0x2f   : > { %5020 = sst [smem:[#allocation31_spill]] %s5101_s20  ;;  %p4118_p7 = por %p74_p6, %p4962_p4 }
  0x30   : > { %p110_p8 = scmp.eq.s32.totalorder %s109_s15, 0  ;;  %s57_s19 = ssub.s32 %s3916_s30, %s5101_s20 }
  0x31   : > { %s5021_s13 = scalar_select %p4118_p7, 1, 0 }
  0x32   : > { %p119_p9 = scmp.ne.s32.totalorder %s3888_s23, %s3884_s22  ;;  %p58_p10 = scmp.eq.s32.totalorder %s57_s19, 0 }
  0x33   : > { %p125_p11 = scmp.ne.s32.totalorder %s3884_s22, %s3880_s21  ;;  %p477_p0 = scmp.eq.s32.totalorder %s4084_s17, 3 }
  0x34   : > { %s4129_s12 = scalar_select %p110_p8, %s3888_s23, %s112_s14  }
  0x35   : > { %s4132_s11 = scalar_select %p58_p10, %s3900_s26, %s60_s16  }
  0x36   : > { %5022 = sst [smem:[#allocation32_spill]] %s4129_s12  ;;  %p4136_p12 = por %p119_p9, %p68_p2 }
  0x37   : > { %5023 = sst [smem:[#allocation33_spill]] %s4132_s11  ;;  %p4142_p13 = por %p125_p11, %p74_p6 }
  0x38   : > { %p483_p5 = scmp.eq.s32.totalorder %s3030_s18, 3  ;;  %p4970_p4 = scmp.lt.s32.totalorder %s3920_s0, 4 }
  0x39   : > { %s5025_s3 = scalar_select %p4142_p13, 1, 0 }
  0x3a   : > { %p4151_p7 = por %p477_p0, %p67_p1  ;;  %p5029_p8 = scmp.ne.s32.totalorder %s3896_s25, %s3892_s24 }
  0x3b   : > { %5026 = sst [smem:[#allocation34_spill]] %s5025_s3  ;;  %s4163_s16 = sand.u32 1, %s3900_s26  }
  0x3c   : > { %s5027_s14 = scalar_select %p4151_p7, 1, 0 }
  0x3d   : > { %p4158_p10 = por %p483_p5, %p5029_p8  ;;  %p4169_p2 = pnand %p4970_p4, %p4101_p3 }
  0x3e   : > { %5028 = sst [smem:[#allocation35_spill]] %s5027_s14  ;;  %s4971_s18 = sand.u32 1, %s3920_s0  }
  0x3f   : > { %s5030_s15 = scalar_select %p4158_p10, 1, 0 }
  0x40   : > { %s5032_s21 = scalar_select %p4169_p2, 1, 0 }
  0x41   : > { %5031 = sst [smem:[#allocation36_spill]] %s5030_s15  ;;  %s3035_s19 = sshll.u32 %s3916_s30, 4 }
  0x42   : > { %s530_s20 = scalar_lea.vmem [#allocation5], %s4163_s16  ;;  %s5033_s1 = sld [smem:[#allocation38_spill]] }
  0x43   : > { %s537_s11 = sshll.u32 %s530_s20, 4  ;;  %s4185_s28 = scalar_lea.sflag [#allocation6], %s4971_s18  ;;  %s4181_s11 = int_to_ptr.vmem [resolvable:$true] %s537_s11 }
  0x44   : > { %p4975_p3 = pneg %p4169_p2 }
  0x48   : > { %s4179_s14 = scalar_lea.hbm %s5033_s1, %s3035_s19  ;;  %s3607_s20 = scalar_lea.hbm %s5033_s1, 32 }
  0x49   : > { %s3602_s26 = scalar_lea.hbm %s4179_s14, 16  ;;  %p3608_p11 = scmp.lt.u32.totalorder %s4179_s14, %s5033_s1 }
  0x4a   : > { %p3603_p1 = scmp.ne.s32.totalorder %s4179_s14, %s3602_s26  ;;  %p3609_p0 = scmp.lt.u32.totalorder %s3607_s20, %s3602_s26 }
  0x4b   : > { %p3611_p8 = scmp.lt.u32.totalorder %s3602_s26, %s4179_s14 }
  0x4c   : > { %p3605_p6 = pnand %p4975_p3, %p3603_p1  ;;  %p3610_p5 = por %p3609_p0, %p3608_p11 }
  0x4e   : > { %p3606_p9 = pneg %p3605_p6  ;;  %p3612_p4 = por %p3611_p8, %p3610_p5 }
  0x50   : > { %p3613_p10 = pnand %p3612_p4, %p3606_p9 }
  0x52   : > { %3616 = shalt.err (!%p3613_p10)
}
  0x53   : > { %s3617_s18 = scalar_lea.vmem %s4181_s11, 16  ;;  %s3922_s12 = smov [#allocation5]  }
  0x54   : > { %p3618_p1 = scmp.ne.s32.totalorder %s4181_s11, %s3617_s18  ;;  %s3622_s24 = sshll.u32 %s3922_s12, 4  ;;  %s3623_s24 = int_to_ptr.vmem [resolvable:$false] %s3622_s24 }
  0x55   : > { %s3624_s15 = scalar_lea.vmem %s3623_s24, 32  ;;  %p3625_p13 = scmp.lt.s32.totalorder %s4181_s11, %s3623_s24 }
  0x56   : > { %p3620_p6 = pnand %p3618_p1, %p4975_p3  ;;  %p3626_p11 = scmp.lt.s32.totalorder %s3624_s15, %s3617_s18 }
  0x58   : > { %p3621_p7 = pneg %p3620_p6  ;;  %p3627_p0 = por %p3626_p11, %p3625_p13 }
  0x5a   : > { %p3628_p5 = pnand %p3627_p0, %p3621_p7 }
  0x5c   : > { %3631 = shalt.err (!%p3628_p5)
}
  0x5d   : > { %3453 = dma.hbm_to_vmem [thread:$0]  (!%p4169_p2), %s4179_s14, 16, %s4181_s11, %s4185_s28  }
  0x5e   : > { %p5034_p4 = scmp.lt.s32.totalorder %s3920_s0, 4  ;;  %p3046_p7 = scmp.ge.s32.totalorder %s3920_s0, 1 }
  0x5f   : > { %p676_p13 = scmp.lt.s32.totalorder %s3920_s0, 5  ;;  %s4224_s18 = sand.u32 1, %s3888_s23  }
  0x60   : > { %p4217_p10 = pnand %p5034_p4, %p4136_p12  ;;  %s3037_s19 = sshll.u32 %s4224_s18, 7 }
  0x61   : > { %p4226_p9 = pnand %p3046_p7, %p676_p13  ;;  %s3087_s12 = sshll.u32 %s3912_s29, 11 }
  0x62   : > { %s5035_s26 = scalar_select %p4217_p10, 1, 0 }
  0x63   : > { %s5036_s20 = scalar_select %p4226_p9, 1, 0 }
  0x64   : > { %s5037_s4 = sld [smem:[#allocation41_spill]]  ;;  %s576_s14 = scalar_lea.vmem [#allocation8], %s3037_s19 }
  0x65   : > { %s583_s15 = sshll.u32 %s576_s14, 4  ;;  %s5038_s1 = sand.u32 1, %s3920_s0   ;;  %s4237_s15 = int_to_ptr.vmem [resolvable:$true] %s583_s15 }
  0x66   : > { %s4241_s23 = scalar_lea.sflag [#allocation9], %s5038_s1  ;;  %p4247_p8 = pneg %p4217_p10 }
  0x6a   : > { %s4235_s9 = scalar_lea.hbm %s5037_s4, %s3087_s12  ;;  %s3637_s19 = scalar_lea.hbm %s5037_s4, 4096 }
  0x6b   : > { %s3632_s7 = scalar_lea.hbm %s4235_s9, 2048  ;;  %p3638_p11 = scmp.lt.u32.totalorder %s4235_s9, %s5037_s4 }
  0x6c   : > { %p3633_p12 = scmp.ne.s32.totalorder %s4235_s9, %s3632_s7  ;;  %p3639_p0 = scmp.lt.u32.totalorder %s3637_s19, %s3632_s7 }
  0x6d   : > { %p3641_p4 = scmp.lt.u32.totalorder %s3632_s7, %s4235_s9 }
  0x6e   : > { %p3635_p1 = pnand %p4247_p8, %p3633_p12  ;;  %p3640_p5 = por %p3639_p0, %p3638_p11 }
  0x70   : > { %p3636_p6 = pneg %p3635_p1  ;;  %p3642_p7 = por %p3641_p4, %p3640_p5 }
  0x72   : > { %p3643_p13 = pnand %p3642_p7, %p3636_p6 }
  0x74   : > { %3646 = shalt.err (!%p3643_p13)
}
  0x75   : > { %s3647_s1 = scalar_lea.vmem %s4237_s15, 2048  ;;  %s3923_s12 = smov [#allocation8]  }
  0x76   : > { %p3648_p12 = scmp.ne.s32.totalorder %s4237_s15, %s3647_s1  ;;  %s3652_s24 = sshll.u32 %s3923_s12, 4  ;;  %s3653_s24 = int_to_ptr.vmem [resolvable:$false] %s3652_s24 }
  0x77   : > { %s3654_s11 = scalar_lea.vmem %s3653_s24, 4096  ;;  %p3655_p9 = scmp.lt.s32.totalorder %s4237_s15, %s3653_s24 }
  0x78   : > { %p3650_p1 = pnand %p3648_p12, %p4247_p8  ;;  %p3656_p2 = scmp.lt.s32.totalorder %s3654_s11, %s3647_s1 }
  0x7a   : > { %p3651_p3 = pneg %p3650_p1  ;;  %p3657_p11 = por %p3656_p2, %p3655_p9 }
  0x7c   : > { %p3658_p0 = pnand %p3657_p11, %p3651_p3 }
  0x7e   : > { %3661 = shalt.err (!%p3658_p0)
}
  0x7f   : > { %s3924_s7 = smov 128   ;;  %s3925_s19 = smov 8  }
  0x80   : > { %3459 = dma.hbm_to_vmem [thread:$0]  (!%p4217_p10), %s4235_s9, 2048, %s4237_s15, %s4241_s23, %s3924_s7, %s3924_s7, %s3925_s19  }
  0x81   : > { %s3033_s14 = sshll.u32 %s4163_s16, 3  ;;  %s3034_s1 = sshll.u32 %s3916_s30, 7 }
  0x82   : > { %s5040_s11 = sld [smem:[#allocation37_spill]]  ;;  %s513_s0 = scalar_lea.vmem [#allocation2], %s3033_s14 }
  0x83   : > { %s520_s5 = sshll.u32 %s513_s0, 4  ;;  %s3429_s27 = smul.u32 384, %s4224_s18  ;;  %s4282_s5 = int_to_ptr.vmem [resolvable:$true] %s520_s5 }
  0x84   : > { %s3430_s3 = smul.u32 6144, %s3912_s29  ;;  %s510_s22 = scalar_lea.sflag [#allocation3], %s4163_s16 }
  0x85   : > { %p5041_p3 = scmp.ne.s32.totalorder %s5032_s21, 0 }
  0x87   : > { %p5042_p9 = pneg %p5041_p3 }
  0x88   : > { %s4279_s4 = scalar_lea.hbm %s5040_s11, %s3034_s1  ;;  %s3667_s1 = scalar_lea.hbm %s5040_s11, 256 }
  0x89   : > { %s3662_s17 = scalar_lea.hbm %s4279_s4, 128  ;;  %p3668_p4 = scmp.lt.u32.totalorder %s4279_s4, %s5040_s11 }
  0x8a   : > { %p3663_p2 = scmp.ne.s32.totalorder %s4279_s4, %s3662_s17  ;;  %p3669_p7 = scmp.lt.u32.totalorder %s3667_s1, %s3662_s17 }
  0x8b   : > { %p3671_p12 = scmp.lt.u32.totalorder %s3662_s17, %s4279_s4 }
  0x8c   : > { %p3665_p6 = pnand %p3663_p2, %p5042_p9  ;;  %p3670_p13 = por %p3669_p7, %p3668_p4 }
  0x8e   : > { %p3666_p5 = pneg %p3665_p6  ;;  %p3672_p1 = por %p3671_p12, %p3670_p13 }
  0x90   : > { %p3673_p11 = pnand %p3672_p1, %p3666_p5 }
  0x92   : > { %3676 = shalt.err (!%p3673_p11)
}
  0x93   : > { %s3677_s0 = scalar_lea.vmem %s4282_s5, 128  ;;  %p5043_p2 = pmov %p5042_p9 }
  0x94   : > { %p3678_p0 = scmp.ne.s32.totalorder %s4282_s5, %s3677_s0  ;;  %s3926_s16 = smov [#allocation2]  }
  0x95   : > { %s3682_s14 = sshll.u32 %s3926_s16, 4  ;;  %s3683_s14 = int_to_ptr.vmem [resolvable:$false] %s3682_s14 }
  0x96   : > { %p3680_p9 = pnand %p3678_p0, %p5043_p2  ;;  %s3684_s9 = scalar_lea.vmem %s3683_s14, 256 }
  0x97   : > { %p3685_p10 = scmp.lt.s32.totalorder %s4282_s5, %s3683_s14  ;;  %p3686_p4 = scmp.lt.s32.totalorder %s3684_s9, %s3677_s0 }
  0x98   : > { %p3681_p6 = pneg %p3680_p9 }
  0x99   : > { %p3687_p7 = por %p3686_p4, %p3685_p10 }
  0x9b   : > { %p3688_p13 = pnand %p3687_p7, %p3681_p6 }
  0x9d   : > { %3691 = shalt.err (!%p3688_p13)
}
  0x9e   : > { %3450 = dma.hbm_to_vmem [thread:$0]  (!%p5041_p3), %s4279_s4, 128, %s4282_s5, %s510_s22  }
  0x9f   : > { %s5044_s2 = sld [smem:[#allocation39_spill]]  ;;  %s548_s12 = scalar_lea.vmem [#allocation7], %s3429_s27 }
  0xa0   : > { %s555_s24 = sshll.u32 %s548_s12, 4  ;;  %s4318_s24 = int_to_ptr.vmem [resolvable:$true] %s555_s24 }
  0xa5   : > { %s4314_s1 = scalar_lea.hbm %s5044_s2, %s3430_s3  ;;  %s3697_s22 = scalar_lea.hbm %s5044_s2, 12288 }
  0xa6   : > { %s3692_s21 = scalar_lea.hbm %s4314_s1, 6144  ;;  %p3698_p12 = scmp.lt.u32.totalorder %s4314_s1, %s5044_s2 }
  0xa7   : > { %p3693_p10 = scmp.ne.s32.totalorder %s4314_s1, %s3692_s21  ;;  %p3699_p1 = scmp.lt.u32.totalorder %s3697_s22, %s3692_s21 }
  0xa8   : > { %p3701_p0 = scmp.lt.u32.totalorder %s3692_s21, %s4314_s1 }
  0xa9   : > { %p3695_p5 = pnand %p3693_p10, %p4247_p8  ;;  %p3700_p11 = por %p3699_p1, %p3698_p12 }
  0xab   : > { %p3696_p3 = pneg %p3695_p5  ;;  %p3702_p2 = por %p3701_p0, %p3700_p11 }
  0xad   : > { %p3703_p9 = pnand %p3702_p2, %p3696_p3 }
  0xaf   : > { %3706 = shalt.err (!%p3703_p9)
}
  0xb0   : > { %s3707_s27 = scalar_lea.vmem %s4318_s24, 6144  ;;  %s3927_s16 = smov [#allocation7]  }
  0xb1   : > { %p3708_p6 = scmp.ne.s32.totalorder %s4318_s24, %s3707_s27  ;;  %s3712_s14 = sshll.u32 %s3927_s16, 4  ;;  %s3713_s14 = int_to_ptr.vmem [resolvable:$false] %s3712_s14 }
  0xb2   : > { %s3714_s9 = scalar_lea.vmem %s3713_s14, 12288  ;;  %p3715_p13 = scmp.lt.s32.totalorder %s4318_s24, %s3713_s14 }
  0xb3   : > { %p3710_p4 = pnand %p3708_p6, %p4247_p8  ;;  %p3716_p10 = scmp.lt.s32.totalorder %s3714_s9, %s3707_s27 }
  0xb5   : > { %p3711_p7 = pneg %p3710_p4  ;;  %p3717_p5 = por %p3716_p10, %p3715_p13 }
  0xb7   : > { %p3718_p12 = pnand %p3717_p5, %p3711_p7 }
  0xb9   : > { %3721 = shalt.err (!%p3718_p12)
}
  0xba   : > { %s3928_s17 = smov 384   ;;  %s3929_s15 = smov 24  }
  0xbb   : > { %p5045_p3 = scmp.ne.s32.totalorder %s5035_s26, 0  ;;  %s3040_s12 = sshll.u32 %s4224_s18, 8 }
  0xbc   : > { %s3088_s21 = sshll.u32 %s3912_s29, 12  ;;  %s5046_s8 = sld [smem:[#allocation45_spill]] }
  0xbd   : > { %3456 = dma.hbm_to_vmem [thread:$0]  (!%p5045_p3), %s4314_s1, 6144, %s4318_s24, %s4185_s28, %s3928_s17, %s3928_s17, %s3929_s15  }
  0xbe   : > { %s615_s3 = scalar_lea.vmem [#allocation10], %s3040_s12 }
  0xbf   : > { %s622_s0 = sshll.u32 %s615_s3, 4  ;;  %s4353_s0 = int_to_ptr.vmem [resolvable:$true] %s622_s0 }
  0xc2   : > { %s4349_s22 = scalar_lea.hbm %s5046_s8, %s3088_s21  ;;  %s3727_s24 = scalar_lea.hbm %s5046_s8, 8192 }
  0xc3   : > { %s3722_s27 = scalar_lea.hbm %s4349_s22, 4096  ;;  %p3728_p2 = scmp.lt.u32.totalorder %s4349_s22, %s5046_s8 }
  0xc4   : > { %p3723_p1 = scmp.ne.s32.totalorder %s4349_s22, %s3722_s27  ;;  %p3729_p9 = scmp.lt.u32.totalorder %s3727_s24, %s3722_s27 }
  0xc5   : > { %p3731_p4 = scmp.lt.u32.totalorder %s3722_s27, %s4349_s22 }
  0xc6   : > { %p3725_p11 = pnand %p3723_p1, %p4247_p8  ;;  %p3730_p6 = por %p3729_p9, %p3728_p2 }
  0xc8   : > { %p3726_p0 = pneg %p3725_p11  ;;  %p3732_p7 = por %p3731_p4, %p3730_p6 }
  0xca   : > { %p3733_p13 = pnand %p3732_p7, %p3726_p0 }
  0xcc   : > { %3736 = shalt.err (!%p3733_p13)
}
  0xcd   : > { %s3737_s9 = scalar_lea.vmem %s4353_s0, 4096  ;;  %s3930_s17 = smov [#allocation10]  }
  0xce   : > { %p3738_p10 = scmp.ne.s32.totalorder %s4353_s0, %s3737_s9  ;;  %s3742_s15 = sshll.u32 %s3930_s17, 4  ;;  %s3743_s15 = int_to_ptr.vmem [resolvable:$false] %s3742_s15 }
  0xcf   : > { %s3744_s4 = scalar_lea.vmem %s3743_s15, 8192  ;;  %p3745_p1 = scmp.lt.s32.totalorder %s4353_s0, %s3743_s15 }
  0xd0   : > { %p3740_p5 = pnand %p3738_p10, %p4247_p8  ;;  %p3746_p11 = scmp.lt.s32.totalorder %s3744_s4, %s3737_s9 }
  0xd2   : > { %p3741_p12 = pneg %p3740_p5  ;;  %p3747_p2 = por %p3746_p11, %p3745_p1 }
  0xd4   : > { %p3748_p9 = pnand %p3747_p2, %p3741_p12 }
  0xd6   : > { %3751 = shalt.err (!%p3748_p9)
}
  0xd7   : > { %s3931_s5 = smov 256   ;;  %s3932_s3 = smov 16  }
  0xd8   : > { %3462 = dma.hbm_to_vmem [thread:$0]  (!%p5045_p3), %s4349_s22, 4096, %s4353_s0, %s4241_s23, %s3931_s5, %s3931_s5, %s3932_s3  }
  0xd9   : > { %s5047_s10 = sld [smem:[#allocation47_spill]]  ;;  %s643_s24 = scalar_lea.vmem [#allocation11], %s3040_s12 }
  0xda   : > { %s650_s16 = sshll.u32 %s643_s24, 4  ;;  %s640_s14 = scalar_lea.sflag [#allocation12], %s4224_s18  ;;  %s4386_s16 = int_to_ptr.vmem [resolvable:$true] %s650_s16 }
  0xdf   : > { %s4382_s1 = scalar_lea.hbm %s5047_s10, %s3088_s21  ;;  %s3757_s21 = scalar_lea.hbm %s5047_s10, 8192 }
  0xe0   : > { %s3752_s9 = scalar_lea.hbm %s4382_s1, 4096  ;;  %p3758_p7 = scmp.lt.u32.totalorder %s4382_s1, %s5047_s10 }
  0xe1   : > { %p3753_p0 = scmp.ne.s32.totalorder %s4382_s1, %s3752_s9  ;;  %p3759_p13 = scmp.lt.u32.totalorder %s3757_s21, %s3752_s9 }
  0xe2   : > { %p3761_p5 = scmp.lt.u32.totalorder %s3752_s9, %s4382_s1 }
  0xe3   : > { %p3755_p6 = pnand %p3753_p0, %p4247_p8  ;;  %p3760_p10 = por %p3759_p13, %p3758_p7 }
  0xe5   : > { %p3756_p4 = pneg %p3755_p6  ;;  %p3762_p12 = por %p3761_p5, %p3760_p10 }
  0xe7   : > { %p3763_p1 = pnand %p3762_p12, %p3756_p4 }
  0xe9   : > { %3766 = shalt.err (!%p3763_p1)
}
  0xea   : > { %s3767_s12 = scalar_lea.vmem %s4386_s16, 4096  ;;  %s3933_s15 = smov [#allocation11]  }
  0xeb   : > { %p3768_p11 = scmp.ne.s32.totalorder %s4386_s16, %s3767_s12  ;;  %s3772_s4 = sshll.u32 %s3933_s15, 4  ;;  %s3773_s4 = int_to_ptr.vmem [resolvable:$false] %s3772_s4 }
  0xec   : > { %s3774_s5 = scalar_lea.vmem %s3773_s4, 8192  ;;  %p3775_p0 = scmp.lt.s32.totalorder %s4386_s16, %s3773_s4 }
  0xed   : > { %p3770_p2 = pnand %p3768_p11, %p4247_p8  ;;  %p3776_p6 = scmp.lt.s32.totalorder %s3774_s5, %s3767_s12 }
  0xef   : > { %p3771_p9 = pneg %p3770_p2  ;;  %p3777_p7 = por %p3776_p6, %p3775_p0 }
  0xf1   : > { %p3778_p13 = pnand %p3777_p7, %p3771_p9 }
  0xf3   : > { %3781 = shalt.err (!%p3778_p13)
}
  0xf4   : > { %3465 = dma.hbm_to_vmem [thread:$0]  (!%p5045_p3), %s4382_s1, 4096, %s4386_s16, %s640_s14, %s3924_s7, %s3924_s7, %s3925_s19  }
  0xf5   : > { %p5048_p8 = scmp.ne.s32.totalorder %s5036_s20, 0 }
  0xf6   : > { %s4418_s6 = sand.u32 (!%p5048_p8), 1, %s3896_s25   ;;  %p5049_p4 = scmp.ne.s32.totalorder (!%p5048_p8), %s5021_s13, 0 }
  0xf7   : > { %680 = sbr.rel (%p5048_p8) target bundleno = 3260 (0xcbc), region = 84  ;;  %s4987_s3 = sshll.u32 (!%p5048_p8), %s4418_s6, 3 }
  0xf8   : > { %s683_s26 = scalar_lea.sflag (!%p5048_p8), [#allocation3], %s4418_s6  ;;  %s4424_s27 = scalar_lea.vmem (!%p5048_p8), [#allocation2], %s4987_s3 }
  0xfe   : > { %3855 = dma.done.wait (%p5049_p4), %s683_s26, 128  }
  0xff   : > { %3857 = vsyncadd (%p5049_p4), %s683_s26, 4294967168  ;;  %s5050_s18 = sld [smem:[#allocation29_spill]] }
 0x105   : > { %s691_s20 = sand.u32 1, %s5050_s18  }
 0x106   : > { %s692_s7 = scalar_lea.sflag [#allocation6], %s691_s20 }
 0x107   : > { %3859 = dma.done.wait (%p5049_p4), %s692_s7, 16  }
 0x108   : > { %3861 = vsyncadd (%p5049_p4), %s692_s7, 4294967280  ;;  %s5051_s28 = sld [smem:[#allocation20_spill]]  ;;  %s5052_s1 = sld [smem:[#allocation34_spill]] }
 0x10e   : > { %s701_s24 = sand.u32 1, %s5051_s28   ;;  %p5053_p3 = scmp.ne.s32.totalorder %s5052_s1, 0 }
 0x10f   : > { %s3431_s16 = smul.u32 384, %s701_s24 }
 0x111   : > { %s4437_s14 = scalar_lea.vmem [#allocation7], %s3431_s16 }
 0x112   : > { %3863 = dma.done.wait (%p5053_p3), %s692_s7, 6144  }
 0x113   : > { %3865 = vsyncadd (%p5053_p3), %s692_s7, 4294961152  ;;  %s3048_s9 = sshll.u32 %s701_s24, 7  ;;  %s709_s23 = scalar_lea.sflag [#allocation9], %s691_s20 }
 0x114   : > { %s4443_s22 = scalar_lea.vmem [#allocation8], %s3048_s9 }
 0x115   : > { %3867 = dma.done.wait (%p5053_p3), %s709_s23, 6144  }
 0x116   : > { %3869 = vsyncadd (%p5053_p3), %s709_s23, 4294961152  ;;  %s3049_s13 = sshll.u32 %s701_s24, 8  ;;  %s727_s0 = scalar_lea.sflag [#allocation12], %s701_s24 }
 0x117   : > { %s4449_s21 = scalar_lea.vmem [#allocation10], %s3049_s13  ;;  %s4451_s17 = scalar_lea.vmem [#allocation11], %s3049_s13 }
 0x118   : > { %3871 = dma.done.wait (%p5053_p3), %s727_s0, 4096  }
 0x119   : > { %3873 = vsyncadd (%p5053_p3), %s727_s0, 4294963200  ;;  %s5054_s12 = sld [smem:[#allocation24_spill]]  ;;  %s5056_s1 = sld [smem:[#allocation43_spill]] }
 0x11a   : > { %s5058_s3 = sld [smem:[#allocation40_spill]]  ;;  %s5059_s30 = sld [smem:[#allocation46_spill]] }
 0x11b   : > { %s5060_s18 = sld [smem:[#allocation48_spill]]  ;;  %s5061_s20 = sld [smem:[#allocation49_spill]] }
 0x11c   : > { %s5062_s13 = sld [smem:[#allocation50_spill]] }
 0x11f   : > { %p829_p10 = scmp.lt.s32.totalorder %s5054_s12, 1  ;;  %p3053_p5 = scmp.ne.s32.totalorder %s5054_s12, 0 }
 0x120   : > { %v859_v0 = vld [vmem:[%s4424_s27] sm:$0xff] (!%p3053_p5) }
 0x121   : > { %s4459_s15 = scalar_select %p829_p10, %s5054_s12, 1 }
 0x122   : > { %858 = sbr.rel (%p3053_p5) target bundleno = 298 (0x12a), region = 112 }
 0x123   : > { %s3432_s4 = smul.u32 3, %s4459_s15  ;;  %s838_s24 = scalar_lea.vmem %s5056_s1, %s4459_s15 }
 0x124   : > { %s3052_s8 = sshll.u32 %s4459_s15, 1  ;;  %s848_s7 = scalar_lea.vmem %s5060_s18, %s4459_s15 }
 0x125   : > { %s4477_s2 = scalar_lea.vmem %s5058_s3, %s3432_s4  ;;  %s4483_s29 = scalar_lea.vmem %s5059_s30, %s3052_s8 }
 0x126   : > { %s851_s16 = scalar_lea.vmem %s5061_s20, %s4459_s15  ;;  %s854_s19 = scalar_lea.vmem %s5062_s13, %s4459_s15 }
 0x127   : > { %s5063_s3 = sshll.u32 %s4418_s6, 3 }
 0x128   : > { %s4499_s4 = scalar_lea.vmem [#allocation13], %s5063_s3 }
 0x129   : > { %860 = vst [vmem:[%s4499_s4] sm:$0xff] %v859_v0 }
 0x12a PF: > { %v901_v6 = vld [vmem:[%s4437_s14 + $0x8] sm:$0xff]  ;;  %v904_v7 = vld [vmem:[%s4437_s14 + $0x20] sm:$0xff]  ;;  %v903_v10 = vld [vmem:[%s4437_s14 + $0x18] sm:$0xff]  ;;  %v3934_v14 = vmov 0.0|0.0   ;;  %v3935_v50 = vmov 0.0   ;;  %vm3936_vm0 = vmmov 0  }
 0x12b   : > { %v3285_v8 = vpack.c.bf16 %v904_v7, %v901_v6  ;;  %v900_v9 = vld [vmem:[%s4437_s14] sm:$0xff]  ;;  %v902_v11 = vld [vmem:[%s4437_s14 + $0x10] sm:$0xff]  ;;  %v905_v13 = vld [vmem:[%s4437_s14 + $0x28] sm:$0xff]  ;;  %3317 = vmatprep.subr.bf16.mxu1 %v3934_v14  ;;  %1029 = vmatprep.mubr.f32.mxu0 %v3935_v50  ;;  %s3937_s20 = smov 32   ;;  %vm1544_vm3 = vcmask 261120   ;;  %s5067_s13 = scalar_lea.vmem [#allocation5], %s4418_s6 }
 0x12c   : > { %v3287_v12 = vpack.c.bf16 %v903_v10, %v900_v9  ;;  %v3318_v15 = vpack.c.bf16 %v905_v13, %v902_v11  ;;  %v907_v16 = vld [vmem:[%s4437_s14 + $0x38] sm:$0xff]  ;;  %v910_v17 = vld [vmem:[%s4437_s14 + $0x50] sm:$0xff]  ;;  %v909_v20 = vld [vmem:[%s4437_s14 + $0x48] sm:$0xff]  ;;  %3207 = vmatprep.mubr.msk.f32.mxu1 %vm3936_vm0, %v3935_v50  ;;  %vm1863_vm5 = vcmask 64512   ;;  %vm2349_vm6 = vcmask 523264   ;;  %s5068_s5 = sld [smem:[#allocation42_spill]] }
 0x12d   : > { %3286 = vmatprep.subr.bf16.mxu0 %v3285_v8  ;;  %v3289_v18 = vpack.c.bf16 %v910_v17, %v907_v16  ;;  %v906_v19 = vld [vmem:[%s4437_s14 + $0x30] sm:$0xff]  ;;  %v908_v21 = vld [vmem:[%s4437_s14 + $0x40] sm:$0xff]  ;;  %v911_v23 = vld [vmem:[%s4437_s14 + $0x58] sm:$0xff]  ;;  %vm2351_vm7 = vcmask 785408  }
 0x12e   : > { %3288 = vmatpush1.bf16.msra.mxu0 %v3287_v12  ;;  %3319 = vmatpush3.bf16.msra.mxu1 %v3318_v15  ;;  %v3291_v22 = vpack.c.bf16 %v909_v20, %v906_v19  ;;  %v3321_v24 = vpack.c.bf16 %v911_v23, %v908_v21  ;;  %v913_v25 = vld [vmem:[%s4437_s14 + $0x68] sm:$0xff]  ;;  %v916_v26 = vld [vmem:[%s4437_s14 + $0x80] sm:$0xff]  ;;  %v915_v29 = vld [vmem:[%s4437_s14 + $0x78] sm:$0xff] }
 0x12f   : > { %3320 = vmatprep.subr.bf16.mxu1 %v3934_v14  ;;  %3290 = vmatprep.subr.bf16.mxu0 %v3289_v18  ;;  %v3293_v27 = vpack.c.bf16 %v916_v26, %v913_v25  ;;  %v912_v28 = vld [vmem:[%s4437_s14 + $0x60] sm:$0xff]  ;;  %v914_v30 = vld [vmem:[%s4437_s14 + $0x70] sm:$0xff]  ;;  %v917_v32 = vld [vmem:[%s4437_s14 + $0x88] sm:$0xff] }
 0x130   : > { %v4505_v1 = vld [vmem:[%s4499_s4] sm:$0xff]  ;;  %v3295_v31 = vpack.c.bf16 %v915_v29, %v912_v28  ;;  %v3324_v33 = vpack.c.bf16 %v917_v32, %v914_v30  ;;  %v919_v34 = vld [vmem:[%s4437_s14 + $0x98] sm:$0xff]  ;;  %v922_v35 = vld [vmem:[%s4437_s14 + $0xb0] sm:$0xff] }
 0x131   : > { %867 = vadd.xlane.f32.xlu0 %v4505_v1  ;;  %v3297_v36 = vpack.c.bf16 %v922_v35, %v919_v34  ;;  %v918_v37 = vld [vmem:[%s4437_s14 + $0x90] sm:$0xff]  ;;  %v921_v38 = vld [vmem:[%s4437_s14 + $0xa8] sm:$0xff]  ;;  %v920_v39 = vld [vmem:[%s4437_s14 + $0xa0] sm:$0xff] }
 0x132   : > { %3292 = vmatpush1.bf16.msra.mxu0 %v3291_v22  ;;  %3322 = vmatpush3.bf16.msra.mxu1 %v3321_v24  ;;  %v3299_v40 = vpack.c.bf16 %v921_v38, %v918_v37  ;;  %v923_v41 = vld [vmem:[%s4437_s14 + $0xb8] sm:$0xff]  ;;  %v925_v43 = vld [vmem:[%s4437_s14 + $0xc8] sm:$0xff]  ;;  %v928_v44 = vld [vmem:[%s4437_s14 + $0xe0] sm:$0xff]  ;;  %s5069_s26 = scalar_lea.vmem %s5068_s5, %s4459_s15 }
 0x133   : > { %3323 = vmatprep.subr.bf16.mxu1 %v3934_v14  ;;  %3294 = vmatprep.subr.bf16.mxu0 %v3293_v27  ;;  %v3327_v42 = vpack.c.bf16 %v923_v41, %v920_v39  ;;  %v924_v45 = vld [vmem:[%s4437_s14 + $0xc0] sm:$0xff]  ;;  %v3301_v46 = vpack.c.bf16 %v928_v44, %v925_v43  ;;  %v927_v47 = vld [vmem:[%s4437_s14 + $0xd8] sm:$0xff]  ;;  %v926_v48 = vld [vmem:[%s4437_s14 + $0xd0] sm:$0xff] }
 0x134   : > { %v929_v49 = vld [vmem:[%s4437_s14 + $0xe8] sm:$0xff]  ;;  %v3303_v51 = vpack.c.bf16 %v927_v47, %v924_v45  ;;  %v931_v53 = vld [vmem:[%s4437_s14 + $0xf8] sm:$0xff]  ;;  %v934_v54 = vld [vmem:[%s4437_s14 + $0x110] sm:$0xff]  ;;  %v3940_v45 = vmov 1983009808  }
 0x135   : > { %v3330_v52 = vpack.c.bf16 %v929_v49, %v926_v48  ;;  %v930_v55 = vld [vmem:[%s4437_s14 + $0xf0] sm:$0xff]  ;;  %v3305_v56 = vpack.c.bf16 %v934_v54, %v931_v53  ;;  %v933_v57 = vld [vmem:[%s4437_s14 + $0x108] sm:$0xff]  ;;  %v932_v58 = vld [vmem:[%s4437_s14 + $0x100] sm:$0xff]  ;;  %v3941_v47 = vmov 1934713408  }
 0x136   : > { %3296 = vmatpush1.bf16.msra.mxu0 %v3295_v31  ;;  %3325 = vmatpush3.bf16.msra.mxu1 %v3324_v33  ;;  %v935_v59 = vld [vmem:[%s4437_s14 + $0x118] sm:$0xff]  ;;  %v3307_v60 = vpack.c.bf16 %v933_v57, %v930_v55  ;;  %v937_v61 = vld [vmem:[%s4437_s14 + $0x128] sm:$0xff]  ;;  %v940_v62 = vld [vmem:[%s4437_s14 + $0x140] sm:$0xff]  ;;  %v950_v33 = vlaneseq  ;;  %v1151_v48 = vunpack.c.l.s4 %v3941_v47 }
 0x137   : > { %3326 = vmatprep.subr.bf16.mxu1 %v3934_v14  ;;  %3298 = vmatprep.subr.bf16.mxu0 %v3297_v36  ;;  %v3333_v63 = vpack.c.bf16 %v935_v59, %v932_v58  ;;  %v3309_v0 = vpack.c.bf16 %v940_v62, %v937_v61  ;;  %v941_v6 = vld [vmem:[%s4437_s14 + $0x148] sm:$0xff]  ;;  %v943_v7 = vld [vmem:[%s4437_s14 + $0x158] sm:$0xff]  ;;  %v946_v8 = vld [vmem:[%s4437_s14 + $0x170] sm:$0xff] }
 0x138   : > { %v3313_v11 = vpack.c.bf16 %v946_v8, %v943_v7  ;;  %v942_v12 = vld [vmem:[%s4437_s14 + $0x150] sm:$0xff]  ;;  %v945_v13 = vld [vmem:[%s4437_s14 + $0x168] sm:$0xff]  ;;  %v944_v15 = vld [vmem:[%s4437_s14 + $0x160] sm:$0xff]  ;;  %v4589_v34 = vshrl.u32 %v950_v33, 7  ;;  %v1152_v53 = vunpack.c.0.s8 %v1151_v48 }
 0x139   : > { %v947_v16 = vld [vmem:[%s4437_s14 + $0x178] sm:$0xff]  ;;  %v3315_v17 = vpack.c.bf16 %v945_v13, %v942_v12  ;;  %v3054_v27 = vld [vmem:[%s838_s24] ss:$0 sm:$0xff]  ;;  %s3938_s24 = smov 96  }
 0x13a   : > { %3300 = vmatpush1.bf16.msra.mxu0 %v3299_v40  ;;  %3328 = vmatpush3.bf16.msra.mxu1 %v3327_v42  ;;  %v3339_v18 = vpack.c.bf16 %v947_v16, %v944_v15  ;;  %v4593_v35 = vld [vmem:[%s4477_s2] sm:$0x7]  ;;  %v4601_v41 = vsub.s32 0, %v4589_v34  ;;  %s3939_s2 = smov 64  }
 0x13b   : > { %3329 = vmatprep.subr.bf16.mxu1 %v3934_v14  ;;  %3302 = vmatprep.subr.bf16.mxu0 %v3301_v46  ;;  %v1119_v46 = vunpack.c.l.s4 %v3940_v45 }
 0x13c   : > { %v953_v43 = vrot.slane %v4593_v35, %v4601_v41 }
 0x13d   : > { %v1120_v49 = vunpack.c.0.s8 %v1119_v46 }
 0x13e   : > { %3304 = vmatpush1.bf16.msra.mxu0 %v3303_v51  ;;  %3331 = vmatpush3.bf16.msra.mxu1 %v3330_v52 }
 0x13f   : > { %3306 = vmatprep.subr.bf16.mxu0 %v3305_v56  ;;  %3332 = vmatprep.subr.bf16.mxu1 %v3934_v14  ;;  %v4612_v54 = vsub.s32 %v1120_v49, %v4589_v34 }
 0x142   : > { %3308 = vmatpush1.bf16.msra.mxu0 %v3307_v60  ;;  %3334 = vmatpush3.bf16.msra.mxu1 %v3333_v63  ;;  %v4615_v60 = vsub.s32 %v1152_v53, %v4589_v34 }
 0x143   : > { %3310 = vmatprep.subr.bf16.mxu0 %v3309_v0  ;;  %3335 = vmatprep.subr.bf16.mxu1 %v3934_v14 }
 0x1be   : > { %v868_v2 = vpop.xlane.xlu0 %867 }
 0x1bf   : > { %v870_v3 = vmul.f32 0.0078125, %v868_v2  ;;  %v936_v2 = vld [vmem:[%s4437_s14 + $0x120] sm:$0xff] }
 0x1c1   : > { %v4509_v4 = vsub.f32 %v4505_v1, %v870_v3  ;;  %v939_v3 = vld [vmem:[%s4437_s14 + $0x138] sm:$0xff] }
 0x1c2   : > { %v3311_v9 = vpack.c.bf16 %v939_v3, %v936_v2 }
 0x1c3   : > { %v872_v5 = vmul.f32 %v4509_v4, %v4509_v4  ;;  %v889_v28 = vmul.f32 %v3054_v27, %v4509_v4  ;;  %v956_v4 = vsub.s32 1, %v4589_v34 }
 0x1c4   : > { %3312 = vmatpush1.bf16.msra.mxu0 %v3311_v9 }
 0x1c5   : > { %873 = vadd.xlane.f32.xlu0 %v872_v5  ;;  %v938_v5 = vld [vmem:[%s4437_s14 + $0x130] sm:$0xff]  ;;  %3314 = vmatprep.subr.bf16.mxu0 %v3313_v11  ;;  %s5065_s14 = sld [smem:[#allocation44_spill]]  ;;  %v957_v36 = vrot.slane %v4593_v35, %v956_v4 }
 0x1c6   : > { %v3336_v10 = vpack.c.bf16 %v941_v6, %v938_v5 }
 0x1c8   : > { %3337 = vmatpush3.bf16.msra.mxu1 %v3336_v10  ;;  %3316 = vmatpush1.bf16.msra.mxu0 %v3315_v17 }
 0x1c9   : > { %3338 = vmatprep.subr.bf16.mxu1 %v3934_v14  ;;  %3341 = vmatprep.subr.bf16.mxu0 %v3934_v14 }
 0x1cb   : > { %s5066_s12 = scalar_lea.vmem %s5065_s14, %s4459_s15 }
 0x1cc   : > { %3340 = vmatpush3.bf16.msra.mxu1 %v3339_v18  ;;  %v3055_v30 = vld [vmem:[%s5066_s12] ss:$0 sm:$0xff] }
 0x1cd   : > { %3210 = vmatprep.subr.mxu1 %v3935_v50 }
 0x252   : > { %v874_v19 = vpop.xlane.xlu0 %873 }
 0x253   : > { %v875_v20 = vmul.f32 0.007874016, %v874_v19 }
 0x255   : > { %3574 = vrsqrt.f32 %v875_v20  ;;  %vm878_vm1 = vcmp.eq.f32.partialorder %v875_v20, inf  ;;  %v881_v23 = vand.u32 2147483648, %v875_v20  ;;  %vm880_vm2 = vcmp.eq.f32.partialorder %v875_v20, 0.0 }
 0x25f   : > { %v3575_v21 = vpop.eup %3574 }
 0x260   : > { %v877_v22 = vmul.f32 %v3575_v21, %v875_v20 }
 0x262   : > { %v879_v24 = vsel %vm878_vm1, %v875_v20, %v877_v22 }
 0x263   : > { %v882_v25 = vsel %vm880_vm2, %v881_v23, %v879_v24 }
 0x264   : > { %v890_v26 = vadd.f32 1e-06, %v882_v25 }
 0x266   : > { %3576 = vrcp.f32 %v890_v26 }
 0x270   : > { %v3577_v29 = vpop.eup %3576 }
 0x271   : > { %v892_v31 = vmul.f32 %v3577_v29, %v889_v28 }
 0x273   : > { %v899_v32 = vadd.f32 %v3055_v30, %v892_v31 }
 0x275   : > { %1030 = vmatmul.mubr.f32.vlgmr.msra.gmra.mrb[0].mxu0 %v899_v32  ;;  %3208 = vmatmul.mubr.f32.vlgmr.msra.gmra.mrb[0].mxu1 %v899_v32 }
 0x276   : > { %3212 = vmatprep.mubr.msk.f32.mxu1 %vm3936_vm0, %v3935_v50  ;;  %3282 = vmatprep.mubr.msk.f32.mxu0 %vm3936_vm0, %v3935_v50 }
 0x348   : > { %v1031_v37 = vpop.f32.mrb[0].mxu0  ;;  %v4598_v38 = vpop.f32.mrb[0].mxu1 }
 0x349   : > { %v1033_v39 = vpop.f32.mrb[1].mxu0  ;;  %v3209_v40 = vpop.f32.mrb[1].mxu1  ;;  %v1032_v44 = vadd.f32 %v1031_v37, %v953_v43 }
 0x34a   : > { %v1034_v42 = vadd.f32 %v1033_v39, %v957_v36 }
 0x34c   : > { %1259 = vrot.lane.b32.xlu0 %v1034_v42, %s3937_s20  ;;  %1253 = vrot.lane.b32.xlu1 %v1034_v42, %s3938_s24 }
 0x350   : > { %1256 = vrot.lane.b32.xlu1 %v1034_v42, %s3939_s2 }
 0x354   : > { %1107 = vrot.lane.b32.xlu1 %v1032_v44, %s3938_s24 }
 0x358   : > { %1110 = vrot.lane.b32.xlu1 %v1032_v44, %s3939_s2 }
 0x35c   : > { %1113 = vrot.lane.b32.xlu1 %v1032_v44, %s3937_s20 }
 0x3be   : > { %v1260_v51 = vpop.permute.xlu0 %1259  ;;  %v1254_v52 = vpop.permute.xlu1 %1253 }
 0x3bf   : > { %v1278_v55 = vcombine.low %v1254_v52, %v1260_v51  ;;  %v1279_v56 = vcombine.high %v1254_v52, %v1260_v51 }
 0x3c1   : > { %v1286_v61 = vrot.slane %v1278_v55, %v4612_v54  ;;  %v1293_v62 = vrot.slane %v1279_v56, %v4612_v54 }
 0x3c2   : > { %v1257_v57 = vpop.permute.xlu1 %1256 }
 0x3c3   : > { %v1262_v58 = vcombine.low %v1034_v42, %v1257_v57  ;;  %v1263_v59 = vcombine.high %v1034_v42, %v1257_v57 }
 0x3c5   : > { %v1270_v63 = vrot.slane %v1262_v58, %v4612_v54  ;;  %v1277_v0 = vrot.slane %v1263_v59, %v4612_v54 }
 0x3c6   : > { %v1108_v2 = vpop.permute.xlu1 %1107 }
 0x3c7   : > { %v1294_v3 = vcombine.low %v1270_v63, %v1286_v61  ;;  %v1295_v5 = vcombine.high %v1270_v63, %v1286_v61  ;;  %v1310_v6 = vcombine.low %v1277_v0, %v1293_v62  ;;  %v1311_v7 = vcombine.high %v1277_v0, %v1293_v62 }
 0x3c9   : > { %v1302_v8 = vrot.slane %v1294_v3, %v4615_v60  ;;  %v1309_v9 = vrot.slane %v1295_v5, %v4615_v60  ;;  %v1318_v10 = vrot.slane %v1310_v6, %v4615_v60  ;;  %v1325_v11 = vrot.slane %v1311_v7, %v4615_v60 }
 0x3ca   : > { %v1111_v12 = vpop.permute.xlu1 %1110 }
 0x3cb   : > { %v1330_v13 = vcombine.low %v1302_v8, %v1309_v9  ;;  %v3058_v15 = vcombine.high %v1302_v8, %v1309_v9  ;;  %v1346_v16 = vcombine.low %v1318_v10, %v1325_v11  ;;  %v3059_v17 = vcombine.high %v1318_v10, %v1325_v11 }
 0x3cc   : > { %v1116_v22 = vcombine.low %v1032_v44, %v1111_v12  ;;  %v1117_v23 = vcombine.high %v1032_v44, %v1111_v12 }
 0x3cd   : > { %v1337_v18 = vrot.slane %v1330_v13, %v4612_v54  ;;  %v1345_v19 = vrot.slane %v3058_v15, %v4612_v54  ;;  %v1353_v20 = vrot.slane %v1346_v16, %v4612_v54  ;;  %v1361_v21 = vrot.slane %v3059_v17, %v4612_v54  ;;  %v862_v17 = vld [vmem:[%s5067_s13] sm:$0x1] }
 0x3ce   : > { %v1114_v24 = vpop.permute.xlu1 %1113  ;;  %v1124_v31 = vrot.slane %v1116_v22, %v4612_v54  ;;  %v1131_v32 = vrot.slane %v1117_v23, %v4612_v54  ;;  %vm863_vm4 = vcmp.eq.f32.partialorder %v862_v17, 0.0 }
 0x3cf   : > { %v1362_v25 = vcombine.low %v1337_v18, %v1345_v19  ;;  %v1378_v26 = vcombine.low %v1353_v20, %v1361_v21  ;;  %v1132_v27 = vcombine.low %v1108_v2, %v1114_v24  ;;  %v1133_v28 = vcombine.high %v1108_v2, %v1114_v24 }
 0x3d0   : > { %v1363_v61 = vcombine.high %v1337_v18, %v1345_v19  ;;  %v1379_v62 = vcombine.high %v1353_v20, %v1361_v21  ;;  %v864_v18 = vsel %vm863_vm4, -1e+09, %v3935_v50 }
 0x3d1   : > { %v1370_v29 = vrot.slane %v1362_v25, %v4615_v60  ;;  %v1386_v30 = vrot.slane %v1378_v26, %v4615_v60  ;;  %v1140_v33 = vrot.slane %v1132_v27, %v4612_v54  ;;  %v1147_v36 = vrot.slane %v1133_v28, %v4612_v54 }
 0x3d2   : > { %v1377_v7 = vrot.slane %v1363_v61, %v4615_v60  ;;  %v1393_v8 = vrot.slane %v1379_v62, %v4615_v60  ;;  %v1857_v19 = vrot.slane %v864_v18, %v4601_v41 }
 0x3d3   : > { %v1394_v37 = vcombine.low %v1370_v29, %v1386_v30  ;;  %v1148_v39 = vcombine.low %v1124_v31, %v1140_v33  ;;  %v1149_v40 = vcombine.high %v1124_v31, %v1140_v33  ;;  %v1164_v42 = vcombine.low %v1131_v32, %v1147_v36 }
 0x3d4   : > { %v1165_v43 = vcombine.high %v1131_v32, %v1147_v36  ;;  %v1395_v6 = vcombine.high %v1370_v29, %v1386_v30  ;;  %v1396_v12 = vcombine.low %v1377_v7, %v1393_v8  ;;  %v1397_v15 = vcombine.high %v1377_v7, %v1393_v8 }
 0x3d5   : > { %3211 = vmatpush3.xpose.msk.msra.mxu1 %vm1544_vm3, %v1394_v37  ;;  %v1156_v44 = vrot.slane %v1148_v39, %v4615_v60  ;;  %v1163_v45 = vrot.slane %v1149_v40, %v4615_v60  ;;  %v1172_v46 = vrot.slane %v1164_v42, %v4615_v60 }
 0x3d6   : > { %v1179_v47 = vrot.slane %v1165_v43, %v4615_v60  ;;  %3215 = vmatprep.subr.mxu1 %v3935_v50 }
 0x3d7   : > { %v1184_v48 = vcombine.low %v1156_v44, %v1163_v45  ;;  %v3056_v49 = vcombine.high %v1156_v44, %v1163_v45  ;;  %v960_v44 = vsub.s32 2, %v4589_v34 }
 0x3d8   : > { %v1200_v51 = vcombine.low %v1172_v46, %v1179_v47  ;;  %v3057_v52 = vcombine.high %v1172_v46, %v1179_v47 }
 0x3d9   : > { %v1191_v53 = vrot.slane %v1184_v48, %v4612_v54  ;;  %v1199_v55 = vrot.slane %v3056_v49, %v4612_v54  ;;  %v961_v45 = vrot.slane %v4593_v35, %v960_v44 }
 0x3da   : > { %v1207_v56 = vrot.slane %v1200_v51, %v4612_v54  ;;  %v1215_v57 = vrot.slane %v3057_v52, %v4612_v54 }
 0x3db   : > { %v1216_v58 = vcombine.low %v1191_v53, %v1199_v55  ;;  %v1217_v2 = vcombine.high %v1191_v53, %v1199_v55  ;;  %v1103_v46 = vadd.f32 %v4598_v38, %v961_v45 }
 0x3dc   : > { %v1232_v59 = vcombine.low %v1207_v56, %v1215_v57  ;;  %v1233_v3 = vcombine.high %v1207_v56, %v1215_v57 }
 0x3dd   : > { %v1224_v63 = vrot.slane %v1216_v58, %v4615_v60  ;;  %v1231_v10 = vrot.slane %v1217_v2, %v4615_v60 }
 0x3de   : > { %v1240_v0 = vrot.slane %v1232_v59, %v4615_v60  ;;  %v1247_v11 = vrot.slane %v1233_v3, %v4615_v60 }
 0x3e0   : > { %v1248_v5 = vcombine.low %v1224_v63, %v1240_v0  ;;  %v1249_v9 = vcombine.high %v1224_v63, %v1240_v0  ;;  %v1250_v13 = vcombine.low %v1231_v10, %v1247_v11  ;;  %v1251_v16 = vcombine.high %v1231_v10, %v1247_v11 }
 0x3e2   : > { %3213 = vmatmul.mubr.msk.f32.vlgmr.msra.gmra.mrb[2].mxu1 %vm1544_vm3, %v1248_v5 }
 0x3e3   : > { %3216 = vmatpush3.xpose.msk.msra.mxu1 %vm1544_vm3, %v1395_v6  ;;  %3217 = vmatprep.mubr.msk.f32.mxu1 %vm3936_vm0, %v3935_v50 }
 0x3e4   : > { %3220 = vmatprep.subr.mxu1 %v3935_v50 }
 0x3e6   : > { %3218 = vmatmul.mubr.msk.f32.vlgmr.msra.gmra.mrb[4].mxu1 %vm1544_vm3, %v1249_v9 }
 0x3e7   : > { %3221 = vmatpush3.xpose.msk.msra.mxu1 %vm1544_vm3, %v1396_v12  ;;  %3222 = vmatprep.mubr.msk.f32.mxu1 %vm3936_vm0, %v3935_v50 }
 0x3e8   : > { %3225 = vmatprep.subr.mxu1 %v3935_v50 }
 0x3ea   : > { %3223 = vmatmul.mubr.msk.f32.vlgmr.msra.gmra.mrb[6].mxu1 %vm1544_vm3, %v1250_v13 }
 0x3eb   : > { %3226 = vmatpush3.xpose.msk.msra.mxu1 %vm1544_vm3, %v1397_v15  ;;  %3227 = vmatprep.mubr.msk.f32.mxu1 %vm3936_vm0, %v3935_v50 }
 0x3ec   : > { %3230 = vmatprep.subr.mxu1 %v3935_v50 }
 0x3ee   : > { %3228 = vmatmul.mubr.msk.f32.vlgmr.msra.gmra.mrb[8].mxu1 %vm1544_vm3, %v1251_v16 }
 0x3ef   : > { %3232 = vmatprep.mubr.msk.f32.mxu1 %vm3936_vm0, %v3935_v50 }
 0x4b5   : > { %v1617_v20 = vpop.f32.mrb[2].mxu1 }
 0x4b6   : > { %v1849_v21 = vmul.f32 0.17677669, %v1617_v20  ;;  %v3214_v22 = vpop.f32.mrb[3].mxu1 }
 0x4b8   : > { %v1859_v23 = vadd.f32 %v1857_v19, %v1849_v21 }
 0x4b9   : > { %v1693_v24 = vpop.f32.mrb[4].mxu1 }
 0x4ba   : > { %v1850_v25 = vmul.f32 0.17677669, %v1693_v24  ;;  %v3219_v26 = vpop.f32.mrb[5].mxu1  ;;  %v1864_v27 = vsel %vm1863_vm5, %v1859_v23, -inf }
 0x4bb   : > { %1865 = vmax.xlane.f32.xlu1 %v1864_v27 }
 0x4bc   : > { %v1860_v28 = vadd.f32 %v1857_v19, %v1850_v25 }
 0x4bd   : > { %v1769_v29 = vpop.f32.mrb[6].mxu1 }
 0x4be   : > { %v1851_v30 = vmul.f32 0.17677669, %v1769_v29  ;;  %v3224_v31 = vpop.f32.mrb[7].mxu1  ;;  %v1867_v32 = vsel %vm1863_vm5, %v1860_v28, -inf }
 0x4bf   : > { %1868 = vmax.xlane.f32.xlu0 %v1867_v32 }
 0x4c0   : > { %v1861_v33 = vadd.f32 %v1857_v19, %v1851_v30 }
 0x4c1   : > { %v1845_v36 = vpop.f32.mrb[8].mxu1 }
 0x4c2   : > { %v1852_v37 = vmul.f32 0.17677669, %v1845_v36  ;;  %v3229_v39 = vpop.f32.mrb[9].mxu1  ;;  %v1870_v40 = vsel %vm1863_vm5, %v1861_v33, -inf }
 0x4c3   : > { %1871 = vmax.xlane.f32.xlu1 %v1870_v40 }
 0x4c4   : > { %v1862_v42 = vadd.f32 %v1857_v19, %v1852_v37 }
 0x4c6   : > { %v1873_v43 = vsel %vm1863_vm5, %v1862_v42, -inf }
 0x4c7   : > { %1874 = vmax.xlane.f32.xlu1 %v1873_v43 }
 0x4d8   : > { %1402 = vrot.lane.b32.xlu1 %v1103_v46, %s3939_s2 }
 0x548   : > { %v1866_v47 = vpop.xlane.xlu1 %1865 }
 0x549   : > { %v1876_v48 = vsub.f32 %v1859_v23, %v1866_v47 }
 0x54b   : > { %v1880_v49 = vmul.f32 1.442695, %v1876_v48 }
 0x54c   : > { %v1869_v51 = vpop.xlane.xlu0 %1868 }
 0x54d   : > { %3578 = vpow2.f32 %v1880_v49  ;;  %v1877_v52 = vsub.f32 %v1860_v28, %v1869_v51 }
 0x54f   : > { %v1882_v53 = vmul.f32 1.442695, %v1877_v52 }
 0x550   : > { %v1872_v38 = vpop.xlane.xlu1 %1871 }
 0x551   : > { %3580 = vpow2.f32 %v1882_v53  ;;  %v1878_v58 = vsub.f32 %v1861_v33, %v1872_v38 }
 0x553   : > { %v1884_v61 = vmul.f32 1.442695, %v1878_v58 }
 0x554   : > { %v1875_v59 = vpop.xlane.xlu1 %1874 }
 0x555   : > { %v1879_v62 = vsub.f32 %v1862_v42, %v1875_v59  ;;  %3582 = vpow2.f32 %v1884_v61 }
 0x557   : > { %v3579_v55 = vpop.eup %3578  ;;  %v1886_v63 = vmul.f32 1.442695, %v1879_v62 }
 0x558   : > { %v1888_v56 = vsel %vm1863_vm5, %v3579_v55, 0.0  ;;  %v1403_v6 = vpop.permute.xlu1 %1402 }
 0x559   : > { %1889 = vadd.xlane.f32.xlu0 %v1888_v56  ;;  %3584 = vpow2.f32 %v1886_v63  ;;  %v1408_v9 = vcombine.low %v1103_v46, %v1403_v6  ;;  %v1409_v10 = vcombine.high %v1103_v46, %v1403_v6  ;;  %v2353_v63 = vld [vmem:[%s4443_s22] sm:$0xff]  ;;  %v2356_v6 = vld [vmem:[%s4443_s22 + $0x18] sm:$0xff] }
 0x55b   : > { %v4682_v57 = vpop.eup %3580  ;;  %v1416_v16 = vrot.slane %v1408_v9, %v4612_v54  ;;  %v1423_v17 = vrot.slane %v1409_v10, %v4612_v54  ;;  %v2360_v10 = vld [vmem:[%s4443_s22 + $0x38] sm:$0xff] }
 0x55c   : > { %v1891_v35 = vsel %vm1863_vm5, %v4682_v57, 0.0 }
 0x55d   : > { %1892 = vadd.xlane.f32.xlu1 %v1891_v35 }
 0x55f   : > { %v4688_v0 = vpop.eup %3582 }
 0x560   : > { %v1894_v2 = vsel %vm1863_vm5, %v4688_v0, 0.0 }
 0x563   : > { %v4692_v3 = vpop.eup %3584 }
 0x564   : > { %v1897_v5 = vsel %vm1863_vm5, %v4692_v3, 0.0 }
 0x56e   : > { %1405 = vrot.lane.b32.xlu1 %v1103_v46, %s3937_s20 }
 0x56f   : > { %1399 = vrot.lane.b32.xlu0 %v1103_v46, %s3938_s24 }
 0x58e   : > { %1895 = vadd.xlane.f32.xlu0 %v1894_v2  ;;  %v2355_v2 = vld [vmem:[%s4443_s22 + $0x10] sm:$0xff] }
 0x592   : > { %1898 = vadd.xlane.f32.xlu1 %v1897_v5 }
 0x5e6   : > { %v1890_v7 = vpop.xlane.xlu0 %1889 }
 0x5e7   : > { %3586 = vrcp.f32 %v1890_v7  ;;  %v3345_v7 = vpack.c.bf16 %v2356_v6, %v2355_v2 }
 0x5ea   : > { %v1893_v8 = vpop.xlane.xlu1 %1892  ;;  %v1400_v11 = vpop.permute.xlu0 %1399 }
 0x5eb   : > { %3588 = vrcp.f32 %v1893_v8  ;;  %v2357_v8 = vld [vmem:[%s4443_s22 + $0x20] sm:$0xff] }
 0x5ee   : > { %v1406_v12 = vpop.permute.xlu1 %1405 }
 0x5ef   : > { %v1424_v13 = vcombine.low %v1400_v11, %v1406_v12  ;;  %v1425_v15 = vcombine.high %v1400_v11, %v1406_v12  ;;  %v2361_v12 = vld [vmem:[%s4443_s22 + $0x40] sm:$0xff] }
 0x5f1   : > { %v1432_v18 = vrot.slane %v1424_v13, %v4612_v54  ;;  %v1439_v19 = vrot.slane %v1425_v15, %v4612_v54  ;;  %v3587_v42 = vpop.eup %3586  ;;  %v2362_v13 = vld [vmem:[%s4443_s22 + $0x48] sm:$0xff] }
 0x5f2   : > { %v1904_v49 = vmul.f32 %v3587_v42, %v3579_v55  ;;  %v3354_v15 = vpack.c.bf16 %v2362_v13, %v2361_v12 }
 0x5f3   : > { %v1440_v20 = vcombine.low %v1416_v16, %v1432_v18  ;;  %v1441_v21 = vcombine.high %v1416_v16, %v1432_v18  ;;  %v1456_v22 = vcombine.low %v1423_v17, %v1439_v19  ;;  %v1457_v23 = vcombine.high %v1423_v17, %v1439_v19  ;;  %v2363_v16 = vld [vmem:[%s4443_s22 + $0x50] sm:$0xff]  ;;  %v2364_v17 = vld [vmem:[%s4443_s22 + $0x58] sm:$0xff]  ;;  %v2365_v19 = vld [vmem:[%s4443_s22 + $0x60] sm:$0xff] }
 0x5f4   : > { %v3357_v18 = vpack.c.bf16 %v2364_v17, %v2363_v16  ;;  %v3076_v16 = vld [vmem:[%s5069_s26] ss:$0 sm:$0xff] }
 0x5f5   : > { %v1448_v24 = vrot.slane %v1440_v20, %v4615_v60  ;;  %v1455_v25 = vrot.slane %v1441_v21, %v4615_v60  ;;  %v1464_v26 = vrot.slane %v1456_v22, %v4615_v60  ;;  %v1471_v27 = vrot.slane %v1457_v23, %v4615_v60  ;;  %v3589_v48 = vpop.eup %3588  ;;  %v2366_v20 = vld [vmem:[%s4443_s22 + $0x68] sm:$0xff] }
 0x5f6   : > { %v1905_v56 = vmul.f32 %v3589_v48, %v4682_v57  ;;  %v3360_v21 = vpack.c.bf16 %v2366_v20, %v2365_v19 }
 0x5f7   : > { %v1476_v28 = vcombine.low %v1448_v24, %v1455_v25  ;;  %v3060_v29 = vcombine.high %v1448_v24, %v1455_v25  ;;  %v1492_v30 = vcombine.low %v1464_v26, %v1471_v27  ;;  %v3061_v31 = vcombine.high %v1464_v26, %v1471_v27 }
 0x5f9   : > { %v1483_v32 = vrot.slane %v1476_v28, %v4612_v54  ;;  %v1491_v33 = vrot.slane %v3060_v29, %v4612_v54  ;;  %v1499_v36 = vrot.slane %v1492_v30, %v4612_v54  ;;  %v1507_v37 = vrot.slane %v3061_v31, %v4612_v54 }
 0x5fb   : > { %v1508_v39 = vcombine.low %v1483_v32, %v1491_v33  ;;  %v1524_v40 = vcombine.low %v1499_v36, %v1507_v37  ;;  %v1509_v45 = vcombine.high %v1483_v32, %v1491_v33  ;;  %v1525_v46 = vcombine.high %v1499_v36, %v1507_v37 }
 0x5fd   : > { %v1516_v43 = vrot.slane %v1508_v39, %v4615_v60  ;;  %v1532_v44 = vrot.slane %v1524_v40, %v4615_v60  ;;  %v1523_v52 = vrot.slane %v1509_v45, %v4615_v60  ;;  %v1539_v53 = vrot.slane %v1525_v46, %v4615_v60  ;;  %v2367_v45 = vld [vmem:[%s4443_s22 + $0x70] sm:$0xff]  ;;  %v2368_v46 = vld [vmem:[%s4443_s22 + $0x78] sm:$0xff] }
 0x5ff   : > { %v1540_v47 = vcombine.low %v1516_v43, %v1532_v44  ;;  %v1541_v51 = vcombine.high %v1516_v43, %v1532_v44  ;;  %v1542_v35 = vcombine.low %v1523_v52, %v1539_v53  ;;  %v1543_v59 = vcombine.high %v1523_v52, %v1539_v53 }
 0x600   : > { %v3363_v52 = vpack.c.bf16 %v2368_v46, %v2367_v45  ;;  %v2497_v45 = vld [vmem:[%s4449_s21 + $0x78] sm:$0xff] }
 0x601   : > { %3231 = vmatpush3.msra.mxu1 %v1540_v47 }
 0x602   : > { %3233 = vmatmul.mubr.msk.f32.vlgmr.msra.gmra.mrb[10].mxu1 %vm1863_vm5, %v1904_v49  ;;  %3235 = vmatprep.subr.mxu1 %v3935_v50 }
 0x603   : > { %3236 = vmatpush3.msra.mxu1 %v1541_v51  ;;  %3237 = vmatprep.mubr.msk.f32.mxu1 %vm3936_vm0, %v3935_v50 }
 0x604   : > { %3240 = vmatprep.subr.mxu1 %v3935_v50 }
 0x606   : > { %3238 = vmatmul.mubr.msk.f32.vlgmr.msra.gmra.mrb[12].mxu1 %vm1863_vm5, %v1905_v56 }
 0x607   : > { %3241 = vmatpush3.msra.mxu1 %v1542_v35  ;;  %3242 = vmatprep.mubr.msk.f32.mxu1 %vm3936_vm0, %v3935_v50 }
 0x608   : > { %3245 = vmatprep.subr.mxu1 %v3935_v50 }
 0x61b   : > { %v1896_v55 = vpop.xlane.xlu0 %1895 }
 0x61c   : > { %3590 = vrcp.f32 %v1896_v55 }
 0x61f   : > { %v1899_v38 = vpop.xlane.xlu1 %1898 }
 0x620   : > { %3592 = vrcp.f32 %v1899_v38 }
 0x626   : > { %v3591_v57 = vpop.eup %3590 }
 0x627   : > { %v1906_v58 = vmul.f32 %v3591_v57, %v4688_v0  ;;  %v2354_v0 = vld [vmem:[%s4443_s22 + $0x8] sm:$0xff] }
 0x628   : > { %v3342_v5 = vpack.c.bf16 %v2354_v0, %v2353_v63 }
 0x629   : > { %3243 = vmatmul.mubr.msk.f32.vlgmr.msra.gmra.mrb[14].mxu1 %vm1863_vm5, %v1906_v58 }
 0x62a   : > { %v3593_v61 = vpop.eup %3592  ;;  %3246 = vmatpush3.msra.mxu1 %v1543_v59  ;;  %3247 = vmatprep.mubr.msk.f32.mxu1 %vm3936_vm0, %v3935_v50 }
 0x62b   : > { %v1907_v62 = vmul.f32 %v3593_v61, %v4692_v3  ;;  %3343 = vmatpush3.bf16.msra.mxu0 %v3342_v5  ;;  %v2358_v3 = vld [vmem:[%s4443_s22 + $0x28] sm:$0xff] }
 0x62c   : > { %3344 = vmatprep.subr.bf16.mxu0 %v3934_v14  ;;  %v3348_v9 = vpack.c.bf16 %v2358_v3, %v2357_v8 }
 0x62d   : > { %3248 = vmatmul.mubr.msk.f32.vlgmr.msra.gmra.mrb[16].mxu1 %vm1863_vm5, %v1907_v62 }
 0x62e   : > { %2590 = vmatprep.mubr.f32.mxu1 %v3935_v50  ;;  %v2359_v50 = vld [vmem:[%s4443_s22 + $0x30] sm:$0xff] }
 0x62f   : > { %3346 = vmatpush3.bf16.msra.mxu0 %v3345_v7  ;;  %v3351_v11 = vpack.c.bf16 %v2360_v10, %v2359_v50 }
 0x630   : > { %3347 = vmatprep.subr.bf16.mxu0 %v3934_v14 }
 0x633   : > { %3349 = vmatpush3.bf16.msra.mxu0 %v3348_v9 }
 0x634   : > { %3350 = vmatprep.subr.bf16.mxu0 %v3934_v14 }
 0x637   : > { %3352 = vmatpush3.bf16.msra.mxu0 %v3351_v11 }
 0x638   : > { %3353 = vmatprep.subr.bf16.mxu0 %v3934_v14 }
 0x63b   : > { %3355 = vmatpush3.bf16.msra.mxu0 %v3354_v15 }
 0x63c   : > { %3356 = vmatprep.subr.bf16.mxu0 %v3934_v14 }
 0x63f   : > { %3358 = vmatpush3.bf16.msra.mxu0 %v3357_v18 }
 0x640   : > { %3359 = vmatprep.subr.bf16.mxu0 %v3934_v14 }
 0x643   : > { %3361 = vmatpush3.bf16.msra.mxu0 %v3360_v21 }
 0x644   : > { %3362 = vmatprep.subr.bf16.mxu0 %v3934_v14 }
 0x647   : > { %3364 = vmatpush3.bf16.msra.mxu0 %v3363_v52  ;;  %v2501_v52 = vld [vmem:[%s4449_s21 + $0x98] sm:$0xff] }
 0x6d5   : > { %v1977_v22 = vpop.f32.mrb[10].mxu1 }
 0x6d6   : > { %v3234_v23 = vpop.f32.mrb[11].mxu1 }
 0x6d9   : > { %v2050_v24 = vpop.f32.mrb[12].mxu1 }
 0x6da   : > { %v3239_v25 = vpop.f32.mrb[13].mxu1 }
 0x6fc   : > { %v2123_v26 = vpop.f32.mrb[14].mxu1 }
 0x6fd   : > { %v2200_v27 = vcombine.low %v1977_v22, %v2123_v26  ;;  %v2201_v28 = vcombine.high %v1977_v22, %v2123_v26  ;;  %v3244_v29 = vpop.f32.mrb[15].mxu1  ;;  %v2482_v26 = vld [vmem:[%s4449_s21] sm:$0xff] }
 0x6fe   : > { %v2487_v29 = vld [vmem:[%s4449_s21 + $0x28] sm:$0xff] }
 0x6ff   : > { %v2208_v36 = vrot.slane %v2200_v27, %v4612_v54  ;;  %v2215_v37 = vrot.slane %v2201_v28, %v4612_v54  ;;  %v2484_v27 = vld [vmem:[%s4449_s21 + $0x10] sm:$0xff] }
 0x700   : > { %v2196_v30 = vpop.f32.mrb[16].mxu1  ;;  %v3367_v28 = vpack.c.bf16 %v2484_v27, %v2482_v26  ;;  %v2603_v27 = vld [vmem:[%s4451_s17 + $0x20] sm:$0xff] }
 0x701   : > { %v2216_v31 = vcombine.low %v2050_v24, %v2196_v30  ;;  %v2217_v32 = vcombine.high %v2050_v24, %v2196_v30  ;;  %v3249_v33 = vpop.f32.mrb[17].mxu1  ;;  %v2483_v24 = vld [vmem:[%s4449_s21 + $0x8] sm:$0xff]  ;;  %v2489_v30 = vld [vmem:[%s4449_s21 + $0x38] sm:$0xff] }
 0x702   : > { %v2488_v33 = vld [vmem:[%s4449_s21 + $0x30] sm:$0xff] }
 0x703   : > { %v2224_v14 = vrot.slane %v2216_v31, %v4612_v54  ;;  %v2231_v39 = vrot.slane %v2217_v32, %v4612_v54  ;;  %v3369_v31 = vpack.c.bf16 %v2489_v30, %v2487_v29  ;;  %v2486_v32 = vld [vmem:[%s4449_s21 + $0x20] sm:$0xff]  ;;  %v2621_v29 = vld [vmem:[%s4451_s17 + $0xb0] sm:$0xff]  ;;  %v2622_v30 = vld [vmem:[%s4451_s17 + $0xb8] sm:$0xff] }
 0x705   : > { %v2232_v40 = vcombine.low %v2208_v36, %v2224_v14  ;;  %v2233_v42 = vcombine.high %v2208_v36, %v2224_v14  ;;  %v2248_v43 = vcombine.low %v2215_v37, %v2231_v39  ;;  %v2249_v44 = vcombine.high %v2215_v37, %v2231_v39  ;;  %v2491_v37 = vld [vmem:[%s4449_s21 + $0x48] sm:$0xff]  ;;  %v2493_v14 = vld [vmem:[%s4449_s21 + $0x58] sm:$0xff] }
 0x706   : > { %v3371_v36 = vpack.c.bf16 %v2488_v33, %v2486_v32  ;;  %v3373_v39 = vpack.c.bf16 %v2493_v14, %v2491_v37  ;;  %v3409_v32 = vpack.c.bf16 %v2622_v30, %v2621_v29  ;;  %v2605_v33 = vld [vmem:[%s4451_s17 + $0x30] sm:$0xff]  ;;  %v2623_v37 = vld [vmem:[%s4451_s17 + $0xc0] sm:$0xff]  ;;  %v2624_v14 = vld [vmem:[%s4451_s17 + $0xc8] sm:$0xff] }
 0x707   : > { %v2240_v47 = vrot.slane %v2232_v40, %v4615_v60  ;;  %v2247_v48 = vrot.slane %v2233_v42, %v4615_v60  ;;  %v2256_v49 = vrot.slane %v2248_v43, %v4615_v60  ;;  %v2263_v51 = vrot.slane %v2249_v44, %v4615_v60  ;;  %v2490_v40 = vld [vmem:[%s4449_s21 + $0x40] sm:$0xff]  ;;  %v2492_v42 = vld [vmem:[%s4449_s21 + $0x50] sm:$0xff]  ;;  %v2495_v44 = vld [vmem:[%s4449_s21 + $0x68] sm:$0xff] }
 0x708   : > { %v3375_v43 = vpack.c.bf16 %v2492_v42, %v2490_v40  ;;  %v3377_v46 = vpack.c.bf16 %v2497_v45, %v2495_v44  ;;  %v3413_v40 = vpack.c.bf16 %v2624_v14, %v2623_v37  ;;  %v2607_v42 = vld [vmem:[%s4451_s17 + $0x40] sm:$0xff]  ;;  %v2625_v44 = vld [vmem:[%s4451_s17 + $0xd0] sm:$0xff]  ;;  %v2626_v45 = vld [vmem:[%s4451_s17 + $0xd8] sm:$0xff] }
 0x709   : > { %v2268_v53 = vcombine.low %v2240_v47, %v2247_v48  ;;  %v3074_v56 = vcombine.high %v2240_v47, %v2247_v48  ;;  %v2284_v35 = vcombine.low %v2256_v49, %v2263_v51  ;;  %v3075_v55 = vcombine.high %v2256_v49, %v2263_v51  ;;  %v2494_v47 = vld [vmem:[%s4449_s21 + $0x60] sm:$0xff]  ;;  %v2496_v48 = vld [vmem:[%s4449_s21 + $0x70] sm:$0xff]  ;;  %v2499_v51 = vld [vmem:[%s4449_s21 + $0x88] sm:$0xff] }
 0x70a   : > { %v3379_v49 = vpack.c.bf16 %v2496_v48, %v2494_v47  ;;  %v3417_v47 = vpack.c.bf16 %v2626_v45, %v2625_v44  ;;  %v2609_v48 = vld [vmem:[%s4451_s17 + $0x50] sm:$0xff] }
 0x70b   : > { %v2275_v38 = vrot.slane %v2268_v53, %v4612_v54  ;;  %v2283_v57 = vrot.slane %v3074_v56, %v4612_v54  ;;  %v2291_v58 = vrot.slane %v2284_v35, %v4612_v54  ;;  %v2299_v59 = vrot.slane %v3075_v55, %v4612_v54  ;;  %v2498_v56 = vld [vmem:[%s4449_s21 + $0x80] sm:$0xff]  ;;  %v2500_v35 = vld [vmem:[%s4449_s21 + $0x90] sm:$0xff]  ;;  %v2503_v55 = vld [vmem:[%s4449_s21 + $0xa8] sm:$0xff] }
 0x70c   : > { %v3381_v53 = vpack.c.bf16 %v2501_v52, %v2499_v51  ;;  %v2627_v51 = vld [vmem:[%s4451_s17 + $0xe0] sm:$0xff]  ;;  %v2628_v52 = vld [vmem:[%s4451_s17 + $0xe8] sm:$0xff] }
 0x70d   : > { %v2301_v61 = vcombine.high %v2275_v38, %v2283_v57  ;;  %v2317_v62 = vcombine.high %v2291_v58, %v2299_v59  ;;  %v2300_v63 = vcombine.low %v2275_v38, %v2283_v57  ;;  %v2316_v0 = vcombine.low %v2291_v58, %v2299_v59  ;;  %v2505_v57 = vld [vmem:[%s4449_s21 + $0xb8] sm:$0xff]  ;;  %v2502_v58 = vld [vmem:[%s4449_s21 + $0xa0] sm:$0xff]  ;;  %v2504_v59 = vld [vmem:[%s4449_s21 + $0xb0] sm:$0xff] }
 0x70e   : > { %v3383_v38 = vpack.c.bf16 %v2500_v35, %v2498_v56  ;;  %v3421_v56 = vpack.c.bf16 %v2628_v52, %v2627_v51 }
 0x70f   : > { %v2315_v2 = vrot.slane %v2301_v61, %v4615_v60  ;;  %v2331_v5 = vrot.slane %v2317_v62, %v4615_v60  ;;  %v2308_v6 = vrot.slane %v2300_v63, %v4615_v60  ;;  %v2324_v7 = vrot.slane %v2316_v0, %v4615_v60  ;;  %v2507_v62 = vld [vmem:[%s4449_s21 + $0xc8] sm:$0xff]  ;;  %v2509_v63 = vld [vmem:[%s4449_s21 + $0xd8] sm:$0xff] }
 0x710   : > { %v3385_v61 = vpack.c.bf16 %v2505_v57, %v2503_v55  ;;  %v3387_v0 = vpack.c.bf16 %v2504_v59, %v2502_v58 }
 0x711   : > { %v2334_v8 = vcombine.low %v2315_v2, %v2331_v5  ;;  %v2333_v3 = vcombine.high %v2308_v6, %v2324_v7  ;;  %v2335_v9 = vcombine.high %v2315_v2, %v2331_v5  ;;  %v2332_v50 = vcombine.low %v2308_v6, %v2324_v7  ;;  %v2506_v5 = vld [vmem:[%s4449_s21 + $0xc0] sm:$0xff]  ;;  %v2508_v6 = vld [vmem:[%s4449_s21 + $0xd0] sm:$0xff]  ;;  %v2511_v7 = vld [vmem:[%s4449_s21 + $0xe8] sm:$0xff] }
 0x712   : > { %v3389_v2 = vpack.c.bf16 %v2509_v63, %v2507_v62  ;;  %v3077_v63 = vld [vmem:[%s851_s16] ss:$0 sm:$0xff] }
 0x713   : > { %2341 = vrot.lane.b32.xlu1 %v2334_v8, %s3939_s2  ;;  %2337 = vrot.lane.b32.xlu0 %v2333_v3, %s3937_s20  ;;  %v2513_v8 = vld [vmem:[%s4449_s21 + $0xf8] sm:$0xff]  ;;  %v3391_v3 = vpack.c.bf16 %v2508_v6, %v2506_v5  ;;  %v3078_v5 = vld [vmem:[%s854_s19] ss:$0 sm:$0xff]  ;;  %s5073_s19 = sld [smem:[#allocation24_spill]] }
 0x717   : > { %2345 = vrot.lane.b32.xlu0 %v2335_v9, %s3938_s24  ;;  %v3393_v9 = vpack.c.bf16 %v2513_v8, %v2511_v7  ;;  %v2611_v8 = vld [vmem:[%s4451_s17 + $0x60] sm:$0xff] }
 0x719   : > { %p3080_p12 = scmp.ne.s32.totalorder %s5073_s19, 1 }
 0x71a   : > { %s5074_s3 = sld [smem:[#allocation51_spill]] (!%p3080_p12)  ;;  %s5075_s30 = sld [smem:[#allocation52_spill]] (!%p3080_p12) }
 0x785   : > { %v2338_v54 = vpop.permute.xlu0 %2337  ;;  %v2342_v10 = vpop.permute.xlu1 %2341 }
 0x786   : > { %v2348_v11 = vsel %vm1544_vm3, %v2332_v50, %v2338_v54  ;;  %v2510_v50 = vld [vmem:[%s4449_s21 + $0xe0] sm:$0xff]  ;;  %v2512_v54 = vld [vmem:[%s4449_s21 + $0xf0] sm:$0xff] }
 0x787   : > { %v2350_v60 = vsel %vm2349_vm6, %v2348_v11, %v2342_v10  ;;  %v3395_v10 = vpack.c.bf16 %v2512_v54, %v2510_v50  ;;  %v2615_v11 = vld [vmem:[%s4451_s17 + $0x80] sm:$0xff]  ;;  %v2629_v50 = vld [vmem:[%s4451_s17 + $0xf0] sm:$0xff]  ;;  %v2630_v54 = vld [vmem:[%s4451_s17 + $0xf8] sm:$0xff] }
 0x789   : > { %v2346_v12 = vpop.permute.xlu0 %2345 }
 0x78a   : > { %v2352_v13 = vsel %vm2351_vm7, %v2350_v60, %v2346_v12  ;;  %v2616_v12 = vld [vmem:[%s4451_s17 + $0x88] sm:$0xff]  ;;  %v2599_v60 = vld [vmem:[%s4451_s17] sm:$0xff] }
 0x78b   : > { %3283 = vmatmul.mubr.f32.vlgmr.msra.gmra.mrb[2].mxu0 %v2352_v13  ;;  %v3397_v13 = vpack.c.bf16 %v2616_v12, %v2615_v11  ;;  %v2613_v11 = vld [vmem:[%s4451_s17 + $0x70] sm:$0xff]  ;;  %v2614_v12 = vld [vmem:[%s4451_s17 + $0x78] sm:$0xff] }
 0x78d   : > { %3398 = vmatprep.subr.bf16.mxu0 %v3397_v13 }
 0x85e   : > { %v2435_v15 = vpop.f32.mrb[2].mxu0 }
 0x85f   : > { %v2439_v17 = vadd.f32 %v2435_v15, %v4505_v1  ;;  %v3284_v18 = vpop.f32.mrb[3].mxu0  ;;  %v2485_v1 = vld [vmem:[%s4449_s21 + $0x18] sm:$0xff]  ;;  %v2600_v15 = vld [vmem:[%s4451_s17 + $0x8] sm:$0xff] }
 0x860   : > { %v3365_v25 = vpack.c.bf16 %v2485_v1, %v2483_v24  ;;  %v3399_v18 = vpack.c.bf16 %v2600_v15, %v2599_v60  ;;  %v2619_v24 = vld [vmem:[%s4451_s17 + $0xa0] sm:$0xff]  ;;  %v2620_v1 = vld [vmem:[%s4451_s17 + $0xa8] sm:$0xff] }
 0x861   : > { %v4778_v19 = vadd.f32 %v3076_v16, %v2439_v17  ;;  %v2617_v16 = vld [vmem:[%s4451_s17 + $0x90] sm:$0xff]  ;;  %v2618_v17 = vld [vmem:[%s4451_s17 + $0x98] sm:$0xff]  ;;  %v3405_v26 = vpack.c.bf16 %v2620_v1, %v2619_v24  ;;  %v2514_v60 = vld [vmem:[%s4483_s29] sm:$0x3] }
 0x862   : > { %3366 = vmatprep.subr.bf16.mxu1 %v3365_v25  ;;  %3400 = vmatpush3.bf16.msra.mxu0 %v3399_v18  ;;  %v2519_v13 = vrot.slane %v2514_v60, %v4601_v41  ;;  %v2523_v15 = vrot.slane %v2514_v60, %v956_v4  ;;  %v3079_v41 = vld [vmem:[%s848_s7] ss:$0 sm:$0xff] }
 0x863   : > { %2450 = vadd.xlane.f32.xlu1 %v4778_v19  ;;  %3368 = vmatpush1.bf16.msra.mxu1 %v3367_v28  ;;  %v2604_v28 = vld [vmem:[%s4451_s17 + $0x28] sm:$0xff] }
 0x864   : > { %3370 = vmatprep.subr.bf16.mxu1 %v3369_v31  ;;  %v3407_v31 = vpack.c.bf16 %v2604_v28, %v2603_v27 }
 0x867   : > { %3372 = vmatpush1.bf16.msra.mxu1 %v3371_v36  ;;  %v2606_v36 = vld [vmem:[%s4451_s17 + $0x38] sm:$0xff] }
 0x868   : > { %3374 = vmatprep.subr.bf16.mxu1 %v3373_v39  ;;  %v3411_v39 = vpack.c.bf16 %v2606_v36, %v2605_v33 }
 0x86b   : > { %3376 = vmatpush1.bf16.msra.mxu1 %v3375_v43  ;;  %v2608_v43 = vld [vmem:[%s4451_s17 + $0x48] sm:$0xff] }
 0x86c   : > { %3378 = vmatprep.subr.bf16.mxu1 %v3377_v46  ;;  %v3415_v46 = vpack.c.bf16 %v2608_v43, %v2607_v42  ;;  %v3082_v43 = vld [vmem:[%s5075_s30] ss:$0 sm:$0xff] (!%p3080_p12) }
 0x86f   : > { %3380 = vmatpush1.bf16.msra.mxu1 %v3379_v49  ;;  %v2610_v49 = vld [vmem:[%s4451_s17 + $0x58] sm:$0xff] }
 0x870   : > { %3382 = vmatprep.subr.bf16.mxu1 %v3381_v53  ;;  %v3419_v53 = vpack.c.bf16 %v2610_v49, %v2609_v48 }
 0x873   : > { %3384 = vmatpush1.bf16.msra.mxu1 %v3383_v38 }
 0x874   : > { %3386 = vmatprep.subr.bf16.mxu1 %v3385_v61 }
 0x877   : > { %3388 = vmatpush1.bf16.msra.mxu1 %v3387_v0 }
 0x878   : > { %3390 = vmatprep.subr.bf16.mxu1 %v3389_v2 }
 0x87b   : > { %3392 = vmatpush1.bf16.msra.mxu1 %v3391_v3  ;;  %v2612_v3 = vld [vmem:[%s4451_s17 + $0x68] sm:$0xff] }
 0x87c   : > { %3394 = vmatprep.subr.bf16.mxu1 %v3393_v9  ;;  %v3423_v9 = vpack.c.bf16 %v2612_v3, %v2611_v8 }
 0x87f   : > { %3396 = vmatpush1.bf16.msra.mxu1 %v3395_v10  ;;  %v3425_v10 = vpack.c.bf16 %v2630_v54, %v2629_v50 }
 0x8f0   : > { %v2451_v20 = vpop.xlane.xlu1 %2450 }
 0x8f1   : > { %v2452_v21 = vmul.f32 0.0078125, %v2451_v20  ;;  %v3401_v20 = vpack.c.bf16 %v2618_v17, %v2617_v16 }
 0x8f3   : > { %v4782_v22 = vsub.f32 %v4778_v19, %v2452_v21  ;;  %v2601_v21 = vld [vmem:[%s4451_s17 + $0x10] sm:$0xff]  ;;  %3402 = vmatprep.subr.bf16.mxu0 %v3401_v20 }
 0x8f5   : > { %v2454_v23 = vmul.f32 %v4782_v22, %v4782_v22  ;;  %v2471_v0 = vmul.f32 %v3077_v63, %v4782_v22  ;;  %v3427_v22 = vpack.c.bf16 %v2614_v12, %v2613_v11 }
 0x8f7   : > { %2455 = vadd.xlane.f32.xlu0 %v2454_v23  ;;  %v2602_v23 = vld [vmem:[%s4451_s17 + $0x18] sm:$0xff] }
 0x8f8   : > { %v3403_v25 = vpack.c.bf16 %v2602_v23, %v2601_v21 }
 0x8fa   : > { %3404 = vmatpush3.bf16.msra.mxu0 %v3403_v25 }
 0x8fb   : > { %3406 = vmatprep.subr.bf16.mxu0 %v3405_v26 }
 0x8fe   : > { %3408 = vmatpush3.bf16.msra.mxu0 %v3407_v31 }
 0x8ff   : > { %3410 = vmatprep.subr.bf16.mxu0 %v3409_v32 }
 0x902   : > { %3412 = vmatpush3.bf16.msra.mxu0 %v3411_v39  ;;  %v3081_v39 = vld [vmem:[%s5074_s3] ss:$0 sm:$0xff] (!%p3080_p12) }
 0x903   : > { %3414 = vmatprep.subr.bf16.mxu0 %v3413_v40 }
 0x906   : > { %3416 = vmatpush3.bf16.msra.mxu0 %v3415_v46 }
 0x907   : > { %3418 = vmatprep.subr.bf16.mxu0 %v3417_v47 }
 0x90a   : > { %3420 = vmatpush3.bf16.msra.mxu0 %v3419_v53 }
 0x90b   : > { %3422 = vmatprep.subr.bf16.mxu0 %v3421_v56 }
 0x90e   : > { %3424 = vmatpush3.bf16.msra.mxu0 %v3423_v9 }
 0x90f   : > { %3426 = vmatprep.subr.bf16.mxu0 %v3425_v10 }
 0x912   : > { %3428 = vmatpush3.bf16.msra.mxu0 %v3427_v22 }
 0x984   : > { %v2456_v35 = vpop.xlane.xlu0 %2455 }
 0x985   : > { %v2457_v55 = vmul.f32 0.007874016, %v2456_v35 }
 0x987   : > { %3594 = vrsqrt.f32 %v2457_v55  ;;  %vm2460_vm8 = vcmp.eq.f32.partialorder %v2457_v55, inf  ;;  %v2463_v58 = vand.u32 2147483648, %v2457_v55  ;;  %vm2462_vm9 = vcmp.eq.f32.partialorder %v2457_v55, 0.0 }
 0x991   : > { %v3595_v38 = vpop.eup %3594 }
 0x992   : > { %v2459_v57 = vmul.f32 %v3595_v38, %v2457_v55 }
 0x994   : > { %v2461_v59 = vsel %vm2460_vm8, %v2457_v55, %v2459_v57 }
 0x995   : > { %v2464_v61 = vsel %vm2462_vm9, %v2463_v58, %v2461_v59 }
 0x996   : > { %v2472_v62 = vadd.f32 1e-06, %v2464_v61 }
 0x998   : > { %3596 = vrcp.f32 %v2472_v62 }
 0x9a2   : > { %v3597_v2 = vpop.eup %3596 }
 0x9a3   : > { %v2474_v6 = vmul.f32 %v3597_v2, %v2471_v0 }
 0x9a5   : > { %v2481_v7 = vadd.f32 %v3078_v5, %v2474_v6 }
 0x9a7   : > { %2591 = vmatmul.mubr.f32.vlgmr.msra.gmra.mrb[18].mxu1 %v2481_v7 }
 0xa7a   : > { %v2592_v16 = vpop.f32.mrb[18].mxu1 }
 0xa7b   : > { %v2593_v17 = vadd.f32 %v2592_v16, %v2519_v13  ;;  %v2594_v18 = vpop.f32.mrb[19].mxu1 }
 0xa7c   : > { %v2595_v20 = vadd.f32 %v2594_v18, %v2523_v15 }
 0xa7d   : > { %v2597_v23 = vmax.f32 %v2593_v17, 0.0 }
 0xa7e   : > { %v2598_v21 = vmax.f32 %v2595_v20, 0.0 }
 0xa80   : > { %2695 = vmatprep.mubr.f32.mxu0 %v2598_v21 }
 0xa81   : > { %2696 = vmatmul.mubr.f32.vlgmr.msra.gmra.mrb[4].mxu0 %v2597_v23 }
 0xb54   : > { %v3172_v24 = vpop.f32.mrb[4].mxu0 }
 0xb55   : > { %v3173_v1 = vpop.f32.mrb[5].mxu0 }
 0xb56   : > { %v3174_v25 = vadd.f32 %v3173_v1, %v3172_v24  ;;  %2714 = sbr.rel (%p3080_p12) target bundleno = 3233 (0xca1), region = 116 }
 0xb58   : > { %v2701_v34 = vadd.f32 %v3174_v25, %v4778_v19 }
 0xb5a   : > { %v2709_v26 = vadd.f32 %v3079_v41, %v2701_v34 }
 0xb5c   : > { %2710 = vst [vmem:[%s4499_s4] sm:$0xff] %v2709_v26  ;;  %2717 = vadd.xlane.f32.xlu0 (!%p3080_p12), %v2709_v26 }
 0xbe9   : > { %v2718_v4 = vpop.xlane.xlu0 %2717 }
 0xbea   : > { %v2719_v27 = vmul.f32 0.0078125, %v2718_v4 }
 0xbec   : > { %v2720_v28 = vsub.f32 %v2709_v26, %v2719_v27 }
 0xbee   : > { %v2721_v29 = vmul.f32 %v2720_v28, %v2720_v28  ;;  %v2738_v40 = vmul.f32 %v3081_v39, %v2720_v28 }
 0xbf0   : > { %2722 = vadd.xlane.f32.xlu0 %v2721_v29 }
 0xc7d   : > { %v2723_v30 = vpop.xlane.xlu0 %2722 }
 0xc7e   : > { %v2724_v31 = vmul.f32 0.007874016, %v2723_v30 }
 0xc80   : > { %3598 = vrsqrt.f32 %v2724_v31  ;;  %vm2727_vm10 = vcmp.eq.f32.partialorder %v2724_v31, inf  ;;  %v2730_v36 = vand.u32 2147483648, %v2724_v31  ;;  %vm2729_vm11 = vcmp.eq.f32.partialorder %v2724_v31, 0.0 }
 0xc8a   : > { %v3599_v32 = vpop.eup %3598 }
 0xc8b   : > { %v2726_v33 = vmul.f32 %v3599_v32, %v2724_v31 }
 0xc8d   : > { %v2728_v19 = vsel %vm2727_vm10, %v2724_v31, %v2726_v33 }
 0xc8e   : > { %v2731_v37 = vsel %vm2729_vm11, %v2730_v36, %v2728_v19 }
 0xc8f   : > { %v2739_v14 = vadd.f32 1e-06, %v2731_v37 }
 0xc91   : > { %3600 = vrcp.f32 %v2739_v14 }
 0xc9b   : > { %v3601_v42 = vpop.eup %3600 }
 0xc9c   : > { %v2741_v44 = vmul.f32 %v3601_v42, %v2738_v40 }
 0xc9e   : > { %v2748_v45 = vadd.f32 %v3082_v43, %v2741_v44 }
 0xca0   : > { %2749 = vst [vmem:[%s4499_s4] sm:$0xff] %v2748_v45 }
 0xca1 PF: > { %s5076_s11 = sld [smem:[#allocation25_spill]]  ;;  %s5077_s27 = sld [smem:[#allocation35_spill]] }
 0xca2   : > { %s5078_s24 = sld [smem:[#allocation53_spill]]  ;;  %s2764_s22 = sshll.u32 %s4499_s4, 4  ;;  %s2765_s22 = int_to_ptr.vmem [resolvable:$true] %s2764_s22 }
 0xca3   : > { %s2751_s0 = scalar_lea.sflag [#allocation4], %s4418_s6  ;;  %s3782_s5 = scalar_lea.vmem %s2765_s22, 128 }
 0xca4   : > { %p3783_p1 = scmp.ne.s32.totalorder %s2765_s22, %s3782_s5  ;;  %s3942_s26 = smov [#allocation13]  }
 0xca5   : > { %s3786_s21 = sshll.u32 %s3942_s26, 4  ;;  %s3787_s21 = int_to_ptr.vmem [resolvable:$false] %s3786_s21 }
 0xca6   : > { %s3788_s18 = scalar_lea.vmem %s3787_s21, 256  ;;  %p3789_p0 = scmp.lt.s32.totalorder %s2765_s22, %s3787_s21 }
 0xca7   : > { %s3084_s14 = sshll.u32 %s5076_s11, 7  ;;  %p5080_p11 = scmp.ne.s32.totalorder %s5077_s27, 0 }
 0xca8   : > { %s5079_s2 = smov %s5078_s24  ;;  %s4884_s13 = scalar_lea.hbm %s5078_s24, %s3084_s14 }
 0xca9   : > { %p3784_p2 = pnand %p3783_p1, %p5080_p11  ;;  %p3790_p6 = scmp.lt.s32.totalorder %s3788_s18, %s3782_s5 }
 0xcab   : > { %p3785_p9 = pneg %p3784_p2  ;;  %p3791_p7 = por %p3790_p6, %p3789_p0 }
 0xcad   : > { %p3792_p13 = pnand %p3791_p7, %p3785_p9 }
 0xcaf   : > { %3795 = shalt.err (!%p3792_p13)
}
 0xcb0   : > { %s3796_s6 = scalar_lea.hbm %s4884_s13, 128  ;;  %s3800_s1 = scalar_lea.hbm %s5079_s2, 256 }
 0xcb1   : > { %p3797_p8 = scmp.ne.s32.totalorder %s4884_s13, %s3796_s6  ;;  %p3801_p10 = scmp.lt.u32.totalorder %s4884_s13, %s5079_s2 }
 0xcb2   : > { %p3802_p5 = scmp.lt.u32.totalorder %s3800_s1, %s3796_s6  ;;  %p3804_p1 = scmp.lt.u32.totalorder %s3796_s6, %s4884_s13 }
 0xcb3   : > { %p3798_p4 = pnand %p3797_p8, %p5080_p11 }
 0xcb4   : > { %p3803_p12 = por %p3802_p5, %p3801_p10 }
 0xcb5   : > { %p3799_p3 = pneg %p3798_p4 }
 0xcb6   : > { %p3805_p2 = por %p3804_p1, %p3803_p12 }
 0xcb8   : > { %p3806_p9 = pnand %p3805_p2, %p3799_p3 }
 0xcba   : > { %3809 = shalt.err (!%p3806_p9)
}
 0xcbb   : > { %3445 = dma.vmem_to_hbm [thread:$0]  (%p5080_p11), %s2765_s22, 128, %s4884_s13, %s2751_s0  }
 0xcbc PF: > { %s5081_s17 = sld [smem:[#allocation28_spill]]  ;;  %s5082_s16 = sld [smem:[#allocation22_spill]] }
 0xcbd   : > { %s5083_s29 = sld [smem:[#allocation36_spill]] }
 0xcc2   : > { %p3471_p0 = scmp.ge.s32.totalorder %s5081_s17, 2  ;;  %s2776_s19 = sand.u32 1, %s5082_s16  }
 0xcc3   : > { %p5084_p6 = scmp.ne.s32.totalorder %s5083_s29, 0  ;;  %s2777_s15 = scalar_lea.sflag [#allocation4], %s2776_s19 }
 0xcc5   : > { %p3467_p7 = pnand %p3471_p0, %p5084_p6 }
 0xcc7   : > { %3875 = dma.done.wait (!%p3467_p7), %s2777_s15, 128  }
 0xcc8   : > { %3877 = vsyncadd (!%p3467_p7), %s2777_s15, 4294967168  ;;  %s41_s0 = sadd.s32 1, %s5081_s17   ;;  %s5085_s21 = sld [smem:[#allocation20_spill]] }
 0xcc9   : > { %p38_p13 = scmp.ge.s32.totalorder %s41_s0, 6   ;;  %s5086_s22 = sld [smem:[#allocation21_spill]] }
 0xcca   : > { %s5087_s23 = sld [smem:[#allocation32_spill]]  ;;  %s5088_s7 = sld [smem:[#allocation23_spill]] }
 0xccb   : > { %s5089_s26 = sld [smem:[#allocation33_spill]]  ;;  %s5090_s27 = sld [smem:[#allocation26_spill]] }
 0xccc   : > { %s5091_s28 = sld [smem:[#allocation27_spill]]  ;;  %s5092_s29 = sld [smem:[#allocation30_spill]] }
 0xccd   : > { %s5093_s30 = sld [smem:[#allocation31_spill]]  ;;  %s5094_s24 = smov %s3896_s25 }
 0xcce   :  { %40 = sbr.rel (!%p38_p13) target bundleno = 33 (0x21), region = 222 }
 0xcd0   : > { %s5095_s25 = smov %s5088_s7 }
 0xcd5   :  { %2782 = vsyncpa [#allocation3], 1 }
 0xcd6   :  { %2784 = vsyncpa [#allocation3 + $0x1], 1 }
 0xcd7   :  { %2785 = vsyncpa [#allocation6], 1 }
 0xcd8   :  { %2787 = vsyncpa [#allocation6 + $0x1], 1 }
 0xcd9   :  { %2788 = vsyncpa [#allocation9], 1 }
 0xcda   :  { %2790 = vsyncpa [#allocation9 + $0x1], 1 }
 0xcdb   :  { %2791 = vsyncpa [#allocation12], 1 }
 0xcdc   :  { %2793 = vsyncpa [#allocation12 + $0x1], 1 }
 0xcdd   :  { %2794 = vsyncpa [#allocation4], 1 }
 0xcde   :  { %2796 = vsyncpa [#allocation4 + $0x1], 1 }

</bundles_post_ra>
